<compile_context>
chip_gen: v7x
topology: tpu7x:2x2x1
jax: 0.10.0
libtpu: 0.0.40
codegen_flags: <defaults>
</compile_context>

<pallas_src>
import functools

import jax
import jax.numpy as jnp
from jax import lax
from jax.experimental import pallas as pl
from jax.experimental.pallas import tpu as pltpu


def _basic_conv2d_kernel(x_ref, w_ref, scale_ref, bias_ref, o_ref,
                         xflat_ref, col_ref, *,
                         Cin, Cout, H, W, KH, KW, P, HC):
    """One image per grid step.

    x_ref:     (1, Cin, H*W)        channels-major input, flat spatial (bf16)
    w_ref:     (Cout, KH*KW*Cin)    weights, K ordered (kh, kw, cin) (bf16)
    scale_ref: (Cout, 1)            BN scale  gamma / sqrt(var + eps)  (f32)
    bias_ref:  (Cout, 1)            BN bias   beta - mean * scale      (f32)
    o_ref:     (1, Cout, Ho, Wo)    NCHW output block (bf16)
    xflat_ref: (Cin, Hpad*Wpad+KW)  VMEM scratch, padded plane, flattened
    col_ref:   (K, HC*Wpad)         VMEM scratch, transposed im2col chunk
    """
    Hpad = H + 2 * P
    Wpad = W + 2 * P
    Ho = Hpad - KH + 1
    Wo = Wpad - KW + 1
    Lp = xflat_ref.shape[1]
    zdt = xflat_ref.dtype

    # ---- stage the padded, channels-major, plane-flattened input in VMEM ----
    # Zero only the halo (not the whole scratch): top strip = top H-halo rows
    # + left halo of the first interior row; bottom strip = right halo of the
    # last interior row + bottom H-halo rows + tail slack.
    top = P * Wpad + P
    if top > 0:
        xflat_ref[:, 0:top] = jnp.zeros((Cin, top), zdt)
    bot = (P + H) * Wpad - P
    if Lp - bot > 0:
        xflat_ref[:, bot:Lp] = jnp.zeros((Cin, Lp - bot), zdt)

    # Interior rows: one contiguous (Cin, W) copy per row, plus a 2P-wide zero
    # strip covering [right halo of row h | left halo of row h+1].
    zstrip = jnp.zeros((Cin, 2 * P), zdt) if P > 0 else None   # hoisted
    for h in range(H):
        r = P + h
        base = r * Wpad + P
        xflat_ref[:, base:base + W] = x_ref[0, :, h * W:(h + 1) * W]
        if P > 0 and h < H - 1:
            xflat_ref[:, base + W:base + W + 2 * P] = zstrip

    # ---- row-chunked im2col + single-K MXU matmul + fused BN/ReLU epilogue ----
    for r0 in range(0, Ho, HC):
        hc = min(HC, Ho - r0)
        mc = hc * Wpad

        # Lane-dense im2col: one contiguous (Cin, mc) slice copy per tap
        # (KH*KW copies total, every store is full-lane-width).
        for kh in range(KH):
            for kw in range(KW):
                t = kh * KW + kw
                s = (r0 + kh) * Wpad + kw
                col_ref[t * Cin:(t + 1) * Cin, 0:mc] = xflat_ref[:, s:s + mc]

        # (Cout, K) x (K, mc) -> (Cout, mc) with f32 accumulation.
        acc = jnp.dot(w_ref[...], col_ref[:, 0:mc],
                      preferred_element_type=jnp.float32)

        # Eval-mode BatchNorm (per-Cout scale/bias, f32) + ReLU.
        y = jnp.maximum(acc * scale_ref[...] + bias_ref[...], 0.0)
        y = y.astype(o_ref.dtype)

        # Store valid columns, dropping the KW-1 garbage columns per padded
        # row.  At production Wo >= 128 each row store is lane-dense.
        for dr in range(hc):
            o_ref[0, :, r0 + dr, :] = y[:, dr * Wpad:dr * Wpad + Wo]


def basic_conv2d(x_nchw, weight_oihw, gamma, beta, running_mean, running_var,
                 *, padding=1, stride=1, eps=1e-5,
                 compute_dtype=jnp.bfloat16, out_dtype=jnp.bfloat16,
                 row_chunk=None):
    """conv2d(bias=False, stride=1) -> BatchNorm2d(eval) -> ReLU, NCHW."""
    assert stride == 1, "only stride=1 is implemented"
    N, Cin, H, W = x_nchw.shape
    Cout, Cin_w, KH, KW = weight_oihw.shape
    assert Cin == Cin_w
    P = int(padding)
    Hpad, Wpad = H + 2 * P, W + 2 * P
    Ho, Wo = Hpad - KH + 1, Wpad - KW + 1
    K = KH * KW * Cin

    # Eval-mode BN folded to per-Cout scale/bias, applied in the f32 epilogue.
    scale = (gamma / jnp.sqrt(running_var + eps)).astype(jnp.float32)
    bias = (beta - running_mean * scale).astype(jnp.float32)
    scale = scale.reshape(Cout, 1)
    bias = bias.reshape(Cout, 1)

    # Weights as (Cout, K) with K ordered (kh, kw, cin) to match the col rows.
    wT = jnp.transpose(weight_oihw, (0, 2, 3, 1)).reshape(Cout, K)
    wT = wT.astype(compute_dtype)

    # Free view: channels-major with a long contiguous minor dim for the DMA.
    x = x_nchw.reshape(N, Cin, H * W).astype(compute_dtype)

    # Row chunk bounds the col scratch / f32 accumulator (~2 MiB target) so the
    # kernel fits v7x's 64 MiB VMEM at production Inception shapes.
    itemsize = jnp.dtype(compute_dtype).itemsize
    if row_chunk is None:
        target = (2 << 20) // itemsize
        row_chunk = max(1, min(Ho, target // max(1, K * Wpad)))
    HC = max(1, min(int(row_chunk), Ho))

    Lp = Hpad * Wpad + KW          # tail slack only read by garbage columns

    vmem_est = (2 * Cin * H * W * itemsize                      # x blocks (x2 buf)
                + 2 * Cout * Ho * Wo * jnp.dtype(out_dtype).itemsize
                + 2 * (Cout * K * itemsize + 2 * Cout * 4)       # weights/scale/bias
                + Cin * Lp * itemsize                            # padded-plane scratch
                + K * HC * Wpad * itemsize                       # col scratch
                + Cout * HC * Wpad * 4)                          # f32 accumulator
    vmem_limit = int(min(max(2 * vmem_est + (8 << 20), 32 << 20), 100 << 20))

    kernel = functools.partial(_basic_conv2d_kernel,
                               Cin=Cin, Cout=Cout, H=H, W=W,
                               KH=KH, KW=KW, P=P, HC=HC)

    out = pl.pallas_call(
        kernel,
        out_shape=jax.ShapeDtypeStruct((N, Cout, Ho, Wo), out_dtype),
        grid_spec=pltpu.PrefetchScalarGridSpec(
            num_scalar_prefetch=0,
            grid=(N,),
            in_specs=[
                pl.BlockSpec((1, Cin, H * W), lambda i: (i, 0, 0)),
                # Constant index maps: weights / scale / bias DMA'd once.
                pl.BlockSpec((Cout, K), lambda i: (0, 0)),
                pl.BlockSpec((Cout, 1), lambda i: (0, 0)),
                pl.BlockSpec((Cout, 1), lambda i: (0, 0)),
            ],
            out_specs=pl.BlockSpec((1, Cout, Ho, Wo), lambda i: (i, 0, 0, 0)),
            scratch_shapes=[
                pltpu.VMEM((Cin, Lp), compute_dtype),
                pltpu.VMEM((K, HC * Wpad), compute_dtype),
            ],
        ),
        compiler_params=pltpu.CompilerParams(
            dimension_semantics=("parallel",),
            vmem_limit_bytes=vmem_limit),
    )(x, wT, scale, bias)

    return out


def _reference(x_nchw, weight_oihw, gamma, beta, running_mean, running_var,
               *, padding=1, eps=1e-5, quantize_inputs=False):
    x = x_nchw
    w = weight_oihw
    if quantize_inputs:
        x = x.astype(jnp.bfloat16).astype(jnp.float32)
        w = w.astype(jnp.bfloat16).astype(jnp.float32)
    y = lax.conv_general_dilated(
        x, w, window_strides=(1, 1),
        padding=[(padding, padding), (padding, padding)],
        dimension_numbers=("NCHW", "OIHW", "NCHW"),
        preferred_element_type=jnp.float32)
    scale = gamma / jnp.sqrt(running_var + eps)
    bias = beta - running_mean * scale
    y = y * scale[None, :, None, None] + bias[None, :, None, None]
    return jnp.maximum(y, 0.0)


if __name__ == "__main__":
    # Deterministic synthetic parameters: BasicConv2d(4, 8, kernel_size=3, padding=1).
    key = jax.random.PRNGKey(0)
    k_x, k_w, k_g, k_b, k_m, k_v = jax.random.split(key, 6)

    N, Cin, H, W = 2, 4, 16, 16
    Cout, KH, KW, padding = 8, 3, 3, 1

    x = jax.random.normal(k_x, (N, Cin, H, W), jnp.float32)
    weight = jax.random.normal(k_w, (Cout, Cin, KH, KW), jnp.float32) * 0.1
    gamma = jax.random.uniform(k_g, (Cout,), jnp.float32, 0.5, 1.5)
    beta = jax.random.normal(k_b, (Cout,), jnp.float32) * 0.1
    running_mean = jax.random.normal(k_m, (Cout,), jnp.float32) * 0.1
    running_var = jax.random.uniform(k_v, (Cout,), jnp.float32, 0.5, 1.5)

    # row_chunk=8 -> two row chunks at Ho=16, exercising the chunked path.
    out = basic_conv2d(x, weight, gamma, beta, running_mean, running_var,
                       padding=padding, row_chunk=8)
    out = jax.block_until_ready(out)
    assert out.shape == (N, Cout, H, W)
    out_f32 = out.astype(jnp.float32)

    # Check 1: against a reference fed the same bf16-rounded x / weights
    # (isolates kernel arithmetic from the bf16 input cast); tolerance covers
    # MXU accumulation order plus the final bf16 output cast.
    ref_q = _reference(x, weight, gamma, beta, running_mean, running_var,
                       padding=padding, quantize_inputs=True)
    assert jnp.allclose(out_f32, ref_q, atol=2e-2, rtol=2e-2), \
        "mismatch vs bf16-matched reference"

    # Check 2: against full-f32 module semantics; loose tolerance covering the
    # bf16 cast of inputs / weights / output.
    ref_f = _reference(x, weight, gamma, beta, running_mean, running_var,
                       padding=padding, quantize_inputs=False)
    assert jnp.allclose(out_f32, ref_f, atol=8e-2, rtol=8e-2), \
        "mismatch vs f32 reference"

    print("KERNEL_OK")
</pallas_src>

<mosaic_0001>
module attributes {stable_mosaic.version = 11 : i64} {
  func.func @_basic_conv2d_kernel(%arg0: i32, %arg1: memref<1x4x256xbf16, #tpu.memory_space<vmem>>, %arg2: memref<8x36xbf16, #tpu.memory_space<vmem>>, %arg3: memref<8x1xf32, #tpu.memory_space<vmem>>, %arg4: memref<8x1xf32, #tpu.memory_space<vmem>>, %arg5: memref<1x8x16x16xbf16, #tpu.memory_space<vmem>>, %arg6: memref<4x327xbf16, #tpu.memory_space<vmem>>, %arg7: memref<36x144xbf16, #tpu.memory_space<vmem>>) attributes {dimension_semantics = [#tpu.dimension_semantics<parallel>], iteration_bounds = array<i64: 2>, scalar_prefetch = 0 : i64, scratch_operands = 2 : i64, tpu.core_type = #tpu.core_type<tc>, window_params = [{transform_indices = @transform_0, window_bounds = array<i64: 1, 4, 256>}, {pipeline_mode = #tpu.pipeline_mode<synchronous>, transform_indices = @transform_1, window_bounds = array<i64: 8, 36>}, {pipeline_mode = #tpu.pipeline_mode<synchronous>, transform_indices = @transform_2, window_bounds = array<i64: 8, 1>}, {pipeline_mode = #tpu.pipeline_mode<synchronous>, transform_indices = @transform_3, window_bounds = array<i64: 8, 1>}, {transform_indices = @transform_4, window_bounds = array<i64: 1, 8, 16, 16>}]} {
    %cst = arith.constant 0.000000e+00 : bf16
    %0 = vector.broadcast %cst : bf16 to vector<4x19xbf16>
    %c0 = arith.constant 0 : index
    %c0_0 = arith.constant 0 : index
    %1 = vector.load %arg6[%c0, %c0_0] : memref<4x327xbf16, #tpu.memory_space<vmem>>, vector<4x19xbf16>
    tpu.vector_store %arg6[%c0, %c0_0], %0 {strides = array<i32>} : memref<4x327xbf16, #tpu.memory_space<vmem>>, vector<4x19xbf16>,
    %cst_1 = arith.constant 0.000000e+00 : bf16
    %2 = vector.broadcast %cst_1 : bf16 to vector<4x22xbf16>
    %c0_2 = arith.constant 0 : index
    %c305 = arith.constant 305 : index
    %3 = vector.load %arg6[%c0_2, %c305] : memref<4x327xbf16, #tpu.memory_space<vmem>>, vector<4x22xbf16>
    tpu.vector_store %arg6[%c0_2, %c305], %2 {strides = array<i32>} : memref<4x327xbf16, #tpu.memory_space<vmem>>, vector<4x22xbf16>,
    %cst_3 = arith.constant 0.000000e+00 : bf16
    %4 = vector.broadcast %cst_3 : bf16 to vector<4x2xbf16>
    %c0_4 = arith.constant 0 : index
    %c0_5 = arith.constant 0 : index
    %c0_6 = arith.constant 0 : index
    %5 = vector.load %arg1[%c0_4, %c0_5, %c0_6] : memref<1x4x256xbf16, #tpu.memory_space<vmem>>, vector<1x4x16xbf16>
    %6 = vector.shape_cast %5 : vector<1x4x16xbf16> to vector<4x16xbf16>
    %c0_7 = arith.constant 0 : index
    %c19 = arith.constant 19 : index
    %7 = vector.load %arg6[%c0_7, %c19] : memref<4x327xbf16, #tpu.memory_space<vmem>>, vector<4x16xbf16>
    tpu.vector_store %arg6[%c0_7, %c19], %6 {strides = array<i32>} : memref<4x327xbf16, #tpu.memory_space<vmem>>, vector<4x16xbf16>,
    %c0_8 = arith.constant 0 : index
    %c35 = arith.constant 35 : index
    %8 = vector.load %arg6[%c0_8, %c35] : memref<4x327xbf16, #tpu.memory_space<vmem>>, vector<4x2xbf16>
    tpu.vector_store %arg6[%c0_8, %c35], %4 {strides = array<i32>} : memref<4x327xbf16, #tpu.memory_space<vmem>>, vector<4x2xbf16>,
    %c0_9 = arith.constant 0 : index
    %c0_10 = arith.constant 0 : index
    %c16 = arith.constant 16 : index
    %9 = vector.load %arg1[%c0_9, %c0_10, %c16] : memref<1x4x256xbf16, #tpu.memory_space<vmem>>, vector<1x4x16xbf16>
    %10 = vector.shape_cast %9 : vector<1x4x16xbf16> to vector<4x16xbf16>
    %c0_11 = arith.constant 0 : index
    %c37 = arith.constant 37 : index
    %11 = vector.load %arg6[%c0_11, %c37] : memref<4x327xbf16, #tpu.memory_space<vmem>>, vector<4x16xbf16>
    tpu.vector_store %arg6[%c0_11, %c37], %10 {strides = array<i32>} : memref<4x327xbf16, #tpu.memory_space<vmem>>, vector<4x16xbf16>,
    %c0_12 = arith.constant 0 : index
    %c53 = arith.constant 53 : index
    %12 = vector.load %arg6[%c0_12, %c53] : memref<4x327xbf16, #tpu.memory_space<vmem>>, vector<4x2xbf16>
    tpu.vector_store %arg6[%c0_12, %c53], %4 {strides = array<i32>} : memref<4x327xbf16, #tpu.memory_space<vmem>>, vector<4x2xbf16>,
    %c0_13 = arith.constant 0 : index
    %c0_14 = arith.constant 0 : index
    %c32 = arith.constant 32 : index
    %13 = vector.load %arg1[%c0_13, %c0_14, %c32] : memref<1x4x256xbf16, #tpu.memory_space<vmem>>, vector<1x4x16xbf16>
    %14 = vector.shape_cast %13 : vector<1x4x16xbf16> to vector<4x16xbf16>
    %c0_15 = arith.constant 0 : index
    %c55 = arith.constant 55 : index
    %15 = vector.load %arg6[%c0_15, %c55] : memref<4x327xbf16, #tpu.memory_space<vmem>>, vector<4x16xbf16>
    tpu.vector_store %arg6[%c0_15, %c55], %14 {strides = array<i32>} : memref<4x327xbf16, #tpu.memory_space<vmem>>, vector<4x16xbf16>,
    %c0_16 = arith.constant 0 : index
    %c71 = arith.constant 71 : index
    %16 = vector.load %arg6[%c0_16, %c71] : memref<4x327xbf16, #tpu.memory_space<vmem>>, vector<4x2xbf16>
    tpu.vector_store %arg6[%c0_16, %c71], %4 {strides = array<i32>} : memref<4x327xbf16, #tpu.memory_space<vmem>>, vector<4x2xbf16>,
    %c0_17 = arith.constant 0 : index
    %c0_18 = arith.constant 0 : index
    %c48 = arith.constant 48 : index
    %17 = vector.load %arg1[%c0_17, %c0_18, %c48] : memref<1x4x256xbf16, #tpu.memory_space<vmem>>, vector<1x4x16xbf16>
    %18 = vector.shape_cast %17 : vector<1x4x16xbf16> to vector<4x16xbf16>
    %c0_19 = arith.constant 0 : index
    %c73 = arith.constant 73 : index
    %19 = vector.load %arg6[%c0_19, %c73] : memref<4x327xbf16, #tpu.memory_space<vmem>>, vector<4x16xbf16>
    tpu.vector_store %arg6[%c0_19, %c73], %18 {strides = array<i32>} : memref<4x327xbf16, #tpu.memory_space<vmem>>, vector<4x16xbf16>,
    %c0_20 = arith.constant 0 : index
    %c89 = arith.constant 89 : index
    %20 = vector.load %arg6[%c0_20, %c89] : memref<4x327xbf16, #tpu.memory_space<vmem>>, vector<4x2xbf16>
    tpu.vector_store %arg6[%c0_20, %c89], %4 {strides = array<i32>} : memref<4x327xbf16, #tpu.memory_space<vmem>>, vector<4x2xbf16>,
    %c0_21 = arith.constant 0 : index
    %c0_22 = arith.constant 0 : index
    %c64 = arith.constant 64 : index
    %21 = vector.load %arg1[%c0_21, %c0_22, %c64] : memref<1x4x256xbf16, #tpu.memory_space<vmem>>, vector<1x4x16xbf16>
    %22 = vector.shape_cast %21 : vector<1x4x16xbf16> to vector<4x16xbf16>
    %c0_23 = arith.constant 0 : index
    %c91 = arith.constant 91 : index
    %23 = vector.load %arg6[%c0_23, %c91] : memref<4x327xbf16, #tpu.memory_space<vmem>>, vector<4x16xbf16>
    tpu.vector_store %arg6[%c0_23, %c91], %22 {strides = array<i32>} : memref<4x327xbf16, #tpu.memory_space<vmem>>, vector<4x16xbf16>,
    %c0_24 = arith.constant 0 : index
    %c107 = arith.constant 107 : index
    %24 = vector.load %arg6[%c0_24, %c107] : memref<4x327xbf16, #tpu.memory_space<vmem>>, vector<4x2xbf16>
    tpu.vector_store %arg6[%c0_24, %c107], %4 {strides = array<i32>} : memref<4x327xbf16, #tpu.memory_space<vmem>>, vector<4x2xbf16>,
    %c0_25 = arith.constant 0 : index
    %c0_26 = arith.constant 0 : index
    %c80 = arith.constant 80 : index
    %25 = vector.load %arg1[%c0_25, %c0_26, %c80] : memref<1x4x256xbf16, #tpu.memory_space<vmem>>, vector<1x4x16xbf16>
    %26 = vector.shape_cast %25 : vector<1x4x16xbf16> to vector<4x16xbf16>
    %c0_27 = arith.constant 0 : index
    %c109 = arith.constant 109 : index
    %27 = vector.load %arg6[%c0_27, %c109] : memref<4x327xbf16, #tpu.memory_space<vmem>>, vector<4x16xbf16>
    tpu.vector_store %arg6[%c0_27, %c109], %26 {strides = array<i32>} : memref<4x327xbf16, #tpu.memory_space<vmem>>, vector<4x16xbf16>,
    %c0_28 = arith.constant 0 : index
    %c125 = arith.constant 125 : index
    %28 = vector.load %arg6[%c0_28, %c125] : memref<4x327xbf16, #tpu.memory_space<vmem>>, vector<4x2xbf16>
    tpu.vector_store %arg6[%c0_28, %c125], %4 {strides = array<i32>} : memref<4x327xbf16, #tpu.memory_space<vmem>>, vector<4x2xbf16>,
    %c0_29 = arith.constant 0 : index
    %c0_30 = arith.constant 0 : index
    %c96 = arith.constant 96 : index
    %29 = vector.load %arg1[%c0_29, %c0_30, %c96] : memref<1x4x256xbf16, #tpu.memory_space<vmem>>, vector<1x4x16xbf16>
    %30 = vector.shape_cast %29 : vector<1x4x16xbf16> to vector<4x16xbf16>
    %c0_31 = arith.constant 0 : index
    %c127 = arith.constant 127 : index
    %31 = vector.load %arg6[%c0_31, %c127] : memref<4x327xbf16, #tpu.memory_space<vmem>>, vector<4x16xbf16>
    tpu.vector_store %arg6[%c0_31, %c127], %30 {strides = array<i32>} : memref<4x327xbf16, #tpu.memory_space<vmem>>, vector<4x16xbf16>,
    %c0_32 = arith.constant 0 : index
    %c143 = arith.constant 143 : index
    %32 = vector.load %arg6[%c0_32, %c143] : memref<4x327xbf16, #tpu.memory_space<vmem>>, vector<4x2xbf16>
    tpu.vector_store %arg6[%c0_32, %c143], %4 {strides = array<i32>} : memref<4x327xbf16, #tpu.memory_space<vmem>>, vector<4x2xbf16>,
    %c0_33 = arith.constant 0 : index
    %c0_34 = arith.constant 0 : index
    %c112 = arith.constant 112 : index
    %33 = vector.load %arg1[%c0_33, %c0_34, %c112] : memref<1x4x256xbf16, #tpu.memory_space<vmem>>, vector<1x4x16xbf16>
    %34 = vector.shape_cast %33 : vector<1x4x16xbf16> to vector<4x16xbf16>
    %c0_35 = arith.constant 0 : index
    %c145 = arith.constant 145 : index
    %35 = vector.load %arg6[%c0_35, %c145] : memref<4x327xbf16, #tpu.memory_space<vmem>>, vector<4x16xbf16>
    tpu.vector_store %arg6[%c0_35, %c145], %34 {strides = array<i32>} : memref<4x327xbf16, #tpu.memory_space<vmem>>, vector<4x16xbf16>,
    %c0_36 = arith.constant 0 : index
    %c161 = arith.constant 161 : index
    %36 = vector.load %arg6[%c0_36, %c161] : memref<4x327xbf16, #tpu.memory_space<vmem>>, vector<4x2xbf16>
    tpu.vector_store %arg6[%c0_36, %c161], %4 {strides = array<i32>} : memref<4x327xbf16, #tpu.memory_space<vmem>>, vector<4x2xbf16>,
    %c0_37 = arith.constant 0 : index
    %c0_38 = arith.constant 0 : index
    %c128 = arith.constant 128 : index
    %37 = vector.load %arg1[%c0_37, %c0_38, %c128] : memref<1x4x256xbf16, #tpu.memory_space<vmem>>, vector<1x4x16xbf16>
    %38 = vector.shape_cast %37 : vector<1x4x16xbf16> to vector<4x16xbf16>
    %c0_39 = arith.constant 0 : index
    %c163 = arith.constant 163 : index
    %39 = vector.load %arg6[%c0_39, %c163] : memref<4x327xbf16, #tpu.memory_space<vmem>>, vector<4x16xbf16>
    tpu.vector_store %arg6[%c0_39, %c163], %38 {strides = array<i32>} : memref<4x327xbf16, #tpu.memory_space<vmem>>, vector<4x16xbf16>,
    %c0_40 = arith.constant 0 : index
    %c179 = arith.constant 179 : index
    %40 = vector.load %arg6[%c0_40, %c179] : memref<4x327xbf16, #tpu.memory_space<vmem>>, vector<4x2xbf16>
    tpu.vector_store %arg6[%c0_40, %c179], %4 {strides = array<i32>} : memref<4x327xbf16, #tpu.memory_space<vmem>>, vector<4x2xbf16>,
    %c0_41 = arith.constant 0 : index
    %c0_42 = arith.constant 0 : index
    %c144 = arith.constant 144 : index
    %41 = vector.load %arg1[%c0_41, %c0_42, %c144] : memref<1x4x256xbf16, #tpu.memory_space<vmem>>, vector<1x4x16xbf16>
    %42 = vector.shape_cast %41 : vector<1x4x16xbf16> to vector<4x16xbf16>
    %c0_43 = arith.constant 0 : index
    %c181 = arith.constant 181 : index
    %43 = vector.load %arg6[%c0_43, %c181] : memref<4x327xbf16, #tpu.memory_space<vmem>>, vector<4x16xbf16>
    tpu.vector_store %arg6[%c0_43, %c181], %42 {strides = array<i32>} : memref<4x327xbf16, #tpu.memory_space<vmem>>, vector<4x16xbf16>,
    %c0_44 = arith.constant 0 : index
    %c197 = arith.constant 197 : index
    %44 = vector.load %arg6[%c0_44, %c197] : memref<4x327xbf16, #tpu.memory_space<vmem>>, vector<4x2xbf16>
    tpu.vector_store %arg6[%c0_44, %c197], %4 {strides = array<i32>} : memref<4x327xbf16, #tpu.memory_space<vmem>>, vector<4x2xbf16>,
    %c0_45 = arith.constant 0 : index
    %c0_46 = arith.constant 0 : index
    %c160 = arith.constant 160 : index
    %45 = vector.load %arg1[%c0_45, %c0_46, %c160] : memref<1x4x256xbf16, #tpu.memory_space<vmem>>, vector<1x4x16xbf16>
    %46 = vector.shape_cast %45 : vector<1x4x16xbf16> to vector<4x16xbf16>
    %c0_47 = arith.constant 0 : index
    %c199 = arith.constant 199 : index
    %47 = vector.load %arg6[%c0_47, %c199] : memref<4x327xbf16, #tpu.memory_space<vmem>>, vector<4x16xbf16>
    tpu.vector_store %arg6[%c0_47, %c199], %46 {strides = array<i32>} : memref<4x327xbf16, #tpu.memory_space<vmem>>, vector<4x16xbf16>,
    %c0_48 = arith.constant 0 : index
    %c215 = arith.constant 215 : index
    %48 = vector.load %arg6[%c0_48, %c215] : memref<4x327xbf16, #tpu.memory_space<vmem>>, vector<4x2xbf16>
    tpu.vector_store %arg6[%c0_48, %c215], %4 {strides = array<i32>} : memref<4x327xbf16, #tpu.memory_space<vmem>>, vector<4x2xbf16>,
    %c0_49 = arith.constant 0 : index
    %c0_50 = arith.constant 0 : index
    %c176 = arith.constant 176 : index
    %49 = vector.load %arg1[%c0_49, %c0_50, %c176] : memref<1x4x256xbf16, #tpu.memory_space<vmem>>, vector<1x4x16xbf16>
    %50 = vector.shape_cast %49 : vector<1x4x16xbf16> to vector<4x16xbf16>
    %c0_51 = arith.constant 0 : index
    %c217 = arith.constant 217 : index
    %51 = vector.load %arg6[%c0_51, %c217] : memref<4x327xbf16, #tpu.memory_space<vmem>>, vector<4x16xbf16>
    tpu.vector_store %arg6[%c0_51, %c217], %50 {strides = array<i32>} : memref<4x327xbf16, #tpu.memory_space<vmem>>, vector<4x16xbf16>,
    %c0_52 = arith.constant 0 : index
    %c233 = arith.constant 233 : index
    %52 = vector.load %arg6[%c0_52, %c233] : memref<4x327xbf16, #tpu.memory_space<vmem>>, vector<4x2xbf16>
    tpu.vector_store %arg6[%c0_52, %c233], %4 {strides = array<i32>} : memref<4x327xbf16, #tpu.memory_space<vmem>>, vector<4x2xbf16>,
    %c0_53 = arith.constant 0 : index
    %c0_54 = arith.constant 0 : index
    %c192 = arith.constant 192 : index
    %53 = vector.load %arg1[%c0_53, %c0_54, %c192] : memref<1x4x256xbf16, #tpu.memory_space<vmem>>, vector<1x4x16xbf16>
    %54 = vector.shape_cast %53 : vector<1x4x16xbf16> to vector<4x16xbf16>
    %c0_55 = arith.constant 0 : index
    %c235 = arith.constant 235 : index
    %55 = vector.load %arg6[%c0_55, %c235] : memref<4x327xbf16, #tpu.memory_space<vmem>>, vector<4x16xbf16>
    tpu.vector_store %arg6[%c0_55, %c235], %54 {strides = array<i32>} : memref<4x327xbf16, #tpu.memory_space<vmem>>, vector<4x16xbf16>,
    %c0_56 = arith.constant 0 : index
    %c251 = arith.constant 251 : index
    %56 = vector.load %arg6[%c0_56, %c251] : memref<4x327xbf16, #tpu.memory_space<vmem>>, vector<4x2xbf16>
    tpu.vector_store %arg6[%c0_56, %c251], %4 {strides = array<i32>} : memref<4x327xbf16, #tpu.memory_space<vmem>>, vector<4x2xbf16>,
    %c0_57 = arith.constant 0 : index
    %c0_58 = arith.constant 0 : index
    %c208 = arith.constant 208 : index
    %57 = vector.load %arg1[%c0_57, %c0_58, %c208] : memref<1x4x256xbf16, #tpu.memory_space<vmem>>, vector<1x4x16xbf16>
    %58 = vector.shape_cast %57 : vector<1x4x16xbf16> to vector<4x16xbf16>
    %c0_59 = arith.constant 0 : index
    %c253 = arith.constant 253 : index
    %59 = vector.load %arg6[%c0_59, %c253] : memref<4x327xbf16, #tpu.memory_space<vmem>>, vector<4x16xbf16>
    tpu.vector_store %arg6[%c0_59, %c253], %58 {strides = array<i32>} : memref<4x327xbf16, #tpu.memory_space<vmem>>, vector<4x16xbf16>,
    %c0_60 = arith.constant 0 : index
    %c269 = arith.constant 269 : index
    %60 = vector.load %arg6[%c0_60, %c269] : memref<4x327xbf16, #tpu.memory_space<vmem>>, vector<4x2xbf16>
    tpu.vector_store %arg6[%c0_60, %c269], %4 {strides = array<i32>} : memref<4x327xbf16, #tpu.memory_space<vmem>>, vector<4x2xbf16>,
    %c0_61 = arith.constant 0 : index
    %c0_62 = arith.constant 0 : index
    %c224 = arith.constant 224 : index
    %61 = vector.load %arg1[%c0_61, %c0_62, %c224] : memref<1x4x256xbf16, #tpu.memory_space<vmem>>, vector<1x4x16xbf16>
    %62 = vector.shape_cast %61 : vector<1x4x16xbf16> to vector<4x16xbf16>
    %c0_63 = arith.constant 0 : index
    %c271 = arith.constant 271 : index
    %63 = vector.load %arg6[%c0_63, %c271] : memref<4x327xbf16, #tpu.memory_space<vmem>>, vector<4x16xbf16>
    tpu.vector_store %arg6[%c0_63, %c271], %62 {strides = array<i32>} : memref<4x327xbf16, #tpu.memory_space<vmem>>, vector<4x16xbf16>,
    %c0_64 = arith.constant 0 : index
    %c287 = arith.constant 287 : index
    %64 = vector.load %arg6[%c0_64, %c287] : memref<4x327xbf16, #tpu.memory_space<vmem>>, vector<4x2xbf16>
    tpu.vector_store %arg6[%c0_64, %c287], %4 {strides = array<i32>} : memref<4x327xbf16, #tpu.memory_space<vmem>>, vector<4x2xbf16>,
    %c0_65 = arith.constant 0 : index
    %c0_66 = arith.constant 0 : index
    %c240 = arith.constant 240 : index
    %65 = vector.load %arg1[%c0_65, %c0_66, %c240] : memref<1x4x256xbf16, #tpu.memory_space<vmem>>, vector<1x4x16xbf16>
    %66 = vector.shape_cast %65 : vector<1x4x16xbf16> to vector<4x16xbf16>
    %c0_67 = arith.constant 0 : index
    %c289 = arith.constant 289 : index
    %67 = vector.load %arg6[%c0_67, %c289] : memref<4x327xbf16, #tpu.memory_space<vmem>>, vector<4x16xbf16>
    tpu.vector_store %arg6[%c0_67, %c289], %66 {strides = array<i32>} : memref<4x327xbf16, #tpu.memory_space<vmem>>, vector<4x16xbf16>,
    %c0_68 = arith.constant 0 : index
    %c0_69 = arith.constant 0 : index
    %68 = vector.load %arg6[%c0_68, %c0_69] : memref<4x327xbf16, #tpu.memory_space<vmem>>, vector<4x144xbf16>
    %c0_70 = arith.constant 0 : index
    %c0_71 = arith.constant 0 : index
    %69 = vector.load %arg7[%c0_70, %c0_71] : memref<36x144xbf16, #tpu.memory_space<vmem>>, vector<4x144xbf16>
    tpu.vector_store %arg7[%c0_70, %c0_71], %68 {strides = array<i32>} : memref<36x144xbf16, #tpu.memory_space<vmem>>, vector<4x144xbf16>,
    %c0_72 = arith.constant 0 : index
    %c1 = arith.constant 1 : index
    %70 = vector.load %arg6[%c0_72, %c1] : memref<4x327xbf16, #tpu.memory_space<vmem>>, vector<4x144xbf16>
    %c4 = arith.constant 4 : index
    %c0_73 = arith.constant 0 : index
    %71 = vector.load %arg7[%c4, %c0_73] : memref<36x144xbf16, #tpu.memory_space<vmem>>, vector<4x144xbf16>
    tpu.vector_store %arg7[%c4, %c0_73], %70 {strides = array<i32>} : memref<36x144xbf16, #tpu.memory_space<vmem>>, vector<4x144xbf16>,
    %c0_74 = arith.constant 0 : index
    %c2 = arith.constant 2 : index
    %72 = vector.load %arg6[%c0_74, %c2] : memref<4x327xbf16, #tpu.memory_space<vmem>>, vector<4x144xbf16>
    %c8 = arith.constant 8 : index
    %c0_75 = arith.constant 0 : index
    %73 = vector.load %arg7[%c8, %c0_75] : memref<36x144xbf16, #tpu.memory_space<vmem>>, vector<4x144xbf16>
    tpu.vector_store %arg7[%c8, %c0_75], %72 {strides = array<i32>} : memref<36x144xbf16, #tpu.memory_space<vmem>>, vector<4x144xbf16>,
    %c0_76 = arith.constant 0 : index
    %c18 = arith.constant 18 : index
    %74 = vector.load %arg6[%c0_76, %c18] : memref<4x327xbf16, #tpu.memory_space<vmem>>, vector<4x144xbf16>
    %c12 = arith.constant 12 : index
    %c0_77 = arith.constant 0 : index
    %75 = vector.load %arg7[%c12, %c0_77] : memref<36x144xbf16, #tpu.memory_space<vmem>>, vector<4x144xbf16>
    tpu.vector_store %arg7[%c12, %c0_77], %74 {strides = array<i32>} : memref<36x144xbf16, #tpu.memory_space<vmem>>, vector<4x144xbf16>,
    %c0_78 = arith.constant 0 : index
    %c19_79 = arith.constant 19 : index
    %76 = vector.load %arg6[%c0_78, %c19_79] : memref<4x327xbf16, #tpu.memory_space<vmem>>, vector<4x144xbf16>
    %c16_80 = arith.constant 16 : index
    %c0_81 = arith.constant 0 : index
    %77 = vector.load %arg7[%c16_80, %c0_81] : memref<36x144xbf16, #tpu.memory_space<vmem>>, vector<4x144xbf16>
    tpu.vector_store %arg7[%c16_80, %c0_81], %76 {strides = array<i32>} : memref<36x144xbf16, #tpu.memory_space<vmem>>, vector<4x144xbf16>,
    %c0_82 = arith.constant 0 : index
    %c20 = arith.constant 20 : index
    %78 = vector.load %arg6[%c0_82, %c20] : memref<4x327xbf16, #tpu.memory_space<vmem>>, vector<4x144xbf16>
    %c20_83 = arith.constant 20 : index
    %c0_84 = arith.constant 0 : index
    %79 = vector.load %arg7[%c20_83, %c0_84] : memref<36x144xbf16, #tpu.memory_space<vmem>>, vector<4x144xbf16>
    tpu.vector_store %arg7[%c20_83, %c0_84], %78 {strides = array<i32>} : memref<36x144xbf16, #tpu.memory_space<vmem>>, vector<4x144xbf16>,
    %c0_85 = arith.constant 0 : index
    %c36 = arith.constant 36 : index
    %80 = vector.load %arg6[%c0_85, %c36] : memref<4x327xbf16, #tpu.memory_space<vmem>>, vector<4x144xbf16>
    %c24 = arith.constant 24 : index
    %c0_86 = arith.constant 0 : index
    %81 = vector.load %arg7[%c24, %c0_86] : memref<36x144xbf16, #tpu.memory_space<vmem>>, vector<4x144xbf16>
    tpu.vector_store %arg7[%c24, %c0_86], %80 {strides = array<i32>} : memref<36x144xbf16, #tpu.memory_space<vmem>>, vector<4x144xbf16>,
    %c0_87 = arith.constant 0 : index
    %c37_88 = arith.constant 37 : index
    %82 = vector.load %arg6[%c0_87, %c37_88] : memref<4x327xbf16, #tpu.memory_space<vmem>>, vector<4x144xbf16>
    %c28 = arith.constant 28 : index
    %c0_89 = arith.constant 0 : index
    %83 = vector.load %arg7[%c28, %c0_89] : memref<36x144xbf16, #tpu.memory_space<vmem>>, vector<4x144xbf16>
    tpu.vector_store %arg7[%c28, %c0_89], %82 {strides = array<i32>} : memref<36x144xbf16, #tpu.memory_space<vmem>>, vector<4x144xbf16>,
    %c0_90 = arith.constant 0 : index
    %c38 = arith.constant 38 : index
    %84 = vector.load %arg6[%c0_90, %c38] : memref<4x327xbf16, #tpu.memory_space<vmem>>, vector<4x144xbf16>
    %c32_91 = arith.constant 32 : index
    %c0_92 = arith.constant 0 : index
    %85 = vector.load %arg7[%c32_91, %c0_92] : memref<36x144xbf16, #tpu.memory_space<vmem>>, vector<4x144xbf16>
    tpu.vector_store %arg7[%c32_91, %c0_92], %84 {strides = array<i32>} : memref<36x144xbf16, #tpu.memory_space<vmem>>, vector<4x144xbf16>,
    %c0_93 = arith.constant 0 : index
    %c0_94 = arith.constant 0 : index
    %86 = vector.load %arg2[%c0_93, %c0_94] : memref<8x36xbf16, #tpu.memory_space<vmem>>, vector<8x36xbf16>
    %c0_95 = arith.constant 0 : index
    %c0_96 = arith.constant 0 : index
    %87 = vector.load %arg7[%c0_95, %c0_96] : memref<36x144xbf16, #tpu.memory_space<vmem>>, vector<36x144xbf16>
    %cst_97 = arith.constant dense<0.000000e+00> : vector<8x144xf32>
    %88 = tpu.matmul %86, %87, %cst_97 {dimension_numbers = #tpu.dot_dimension_numbers<[1], [0], [0], [1], [0, 0, 1, 1], [], []>} : vector<8x36xbf16>, vector<36x144xbf16>, vector<8x144xf32> -> vector<8x144xf32>
    %c0_98 = arith.constant 0 : index
    %c0_99 = arith.constant 0 : index
    %89 = vector.load %arg3[%c0_98, %c0_99] : memref<8x1xf32, #tpu.memory_space<vmem>>, vector<8x1xf32>
    %90 = vector.broadcast %89 : vector<8x1xf32> to vector<8x144xf32>
    %91 = arith.mulf %88, %90 : vector<8x144xf32>
    %c0_100 = arith.constant 0 : index
    %c0_101 = arith.constant 0 : index
    %92 = vector.load %arg4[%c0_100, %c0_101] : memref<8x1xf32, #tpu.memory_space<vmem>>, vector<8x1xf32>
    %93 = vector.broadcast %92 : vector<8x1xf32> to vector<8x144xf32>
    %94 = arith.addf %91, %93 : vector<8x144xf32>
    %cst_102 = arith.constant 0.000000e+00 : f32
    %95 = vector.broadcast %cst_102 : f32 to vector<8x144xf32>
    %96 = arith.maximumf %94, %95 : vector<8x144xf32>
    %97 = arith.truncf %96 : vector<8x144xf32> to vector<8x144xbf16>
    %98 = vector.extract_strided_slice %97 {offsets = [0, 0], sizes = [8, 16], strides = [1, 1]} : vector<8x144xbf16> to vector<8x16xbf16>
    %c0_103 = arith.constant 0 : index
    %c0_104 = arith.constant 0 : index
    %c0_105 = arith.constant 0 : index
    %c0_106 = arith.constant 0 : index
    %99 = vector.load %arg5[%c0_103, %c0_104, %c0_105, %c0_106] : memref<1x8x16x16xbf16, #tpu.memory_space<vmem>>, vector<1x8x1x16xbf16>
    %100 = vector.shape_cast %99 : vector<1x8x1x16xbf16> to vector<8x16xbf16>
    %101 = vector.shape_cast %98 : vector<8x16xbf16> to vector<1x8x1x16xbf16>
    tpu.vector_store %arg5[%c0_103, %c0_104, %c0_105, %c0_106], %101 {strides = array<i32>} : memref<1x8x16x16xbf16, #tpu.memory_space<vmem>>, vector<1x8x1x16xbf16>,
    %102 = vector.extract_strided_slice %97 {offsets = [0, 18], sizes = [8, 16], strides = [1, 1]} : vector<8x144xbf16> to vector<8x16xbf16>
    %c0_107 = arith.constant 0 : index
    %c0_108 = arith.constant 0 : index
    %c1_109 = arith.constant 1 : index
    %c0_110 = arith.constant 0 : index
    %103 = vector.load %arg5[%c0_107, %c0_108, %c1_109, %c0_110] : memref<1x8x16x16xbf16, #tpu.memory_space<vmem>>, vector<1x8x1x16xbf16>
    %104 = vector.shape_cast %103 : vector<1x8x1x16xbf16> to vector<8x16xbf16>
    %105 = vector.shape_cast %102 : vector<8x16xbf16> to vector<1x8x1x16xbf16>
    tpu.vector_store %arg5[%c0_107, %c0_108, %c1_109, %c0_110], %105 {strides = array<i32>} : memref<1x8x16x16xbf16, #tpu.memory_space<vmem>>, vector<1x8x1x16xbf16>,
    %106 = vector.extract_strided_slice %97 {offsets = [0, 36], sizes = [8, 16], strides = [1, 1]} : vector<8x144xbf16> to vector<8x16xbf16>
    %c0_111 = arith.constant 0 : index
    %c0_112 = arith.constant 0 : index
    %c2_113 = arith.constant 2 : index
    %c0_114 = arith.constant 0 : index
    %107 = vector.load %arg5[%c0_111, %c0_112, %c2_113, %c0_114] : memref<1x8x16x16xbf16, #tpu.memory_space<vmem>>, vector<1x8x1x16xbf16>
    %108 = vector.shape_cast %107 : vector<1x8x1x16xbf16> to vector<8x16xbf16>
    %109 = vector.shape_cast %106 : vector<8x16xbf16> to vector<1x8x1x16xbf16>
    tpu.vector_store %arg5[%c0_111, %c0_112, %c2_113, %c0_114], %109 {strides = array<i32>} : memref<1x8x16x16xbf16, #tpu.memory_space<vmem>>, vector<1x8x1x16xbf16>,
    %110 = vector.extract_strided_slice %97 {offsets = [0, 54], sizes = [8, 16], strides = [1, 1]} : vector<8x144xbf16> to vector<8x16xbf16>
    %c0_115 = arith.constant 0 : index
    %c0_116 = arith.constant 0 : index
    %c3 = arith.constant 3 : index
    %c0_117 = arith.constant 0 : index
    %111 = vector.load %arg5[%c0_115, %c0_116, %c3, %c0_117] : memref<1x8x16x16xbf16, #tpu.memory_space<vmem>>, vector<1x8x1x16xbf16>
    %112 = vector.shape_cast %111 : vector<1x8x1x16xbf16> to vector<8x16xbf16>
    %113 = vector.shape_cast %110 : vector<8x16xbf16> to vector<1x8x1x16xbf16>
    tpu.vector_store %arg5[%c0_115, %c0_116, %c3, %c0_117], %113 {strides = array<i32>} : memref<1x8x16x16xbf16, #tpu.memory_space<vmem>>, vector<1x8x1x16xbf16>,
    %114 = vector.extract_strided_slice %97 {offsets = [0, 72], sizes = [8, 16], strides = [1, 1]} : vector<8x144xbf16> to vector<8x16xbf16>
    %c0_118 = arith.constant 0 : index
    %c0_119 = arith.constant 0 : index
    %c4_120 = arith.constant 4 : index
    %c0_121 = arith.constant 0 : index
    %115 = vector.load %arg5[%c0_118, %c0_119, %c4_120, %c0_121] : memref<1x8x16x16xbf16, #tpu.memory_space<vmem>>, vector<1x8x1x16xbf16>
    %116 = vector.shape_cast %115 : vector<1x8x1x16xbf16> to vector<8x16xbf16>
    %117 = vector.shape_cast %114 : vector<8x16xbf16> to vector<1x8x1x16xbf16>
    tpu.vector_store %arg5[%c0_118, %c0_119, %c4_120, %c0_121], %117 {strides = array<i32>} : memref<1x8x16x16xbf16, #tpu.memory_space<vmem>>, vector<1x8x1x16xbf16>,
    %118 = vector.extract_strided_slice %97 {offsets = [0, 90], sizes = [8, 16], strides = [1, 1]} : vector<8x144xbf16> to vector<8x16xbf16>
    %c0_122 = arith.constant 0 : index
    %c0_123 = arith.constant 0 : index
    %c5 = arith.constant 5 : index
    %c0_124 = arith.constant 0 : index
    %119 = vector.load %arg5[%c0_122, %c0_123, %c5, %c0_124] : memref<1x8x16x16xbf16, #tpu.memory_space<vmem>>, vector<1x8x1x16xbf16>
    %120 = vector.shape_cast %119 : vector<1x8x1x16xbf16> to vector<8x16xbf16>
    %121 = vector.shape_cast %118 : vector<8x16xbf16> to vector<1x8x1x16xbf16>
    tpu.vector_store %arg5[%c0_122, %c0_123, %c5, %c0_124], %121 {strides = array<i32>} : memref<1x8x16x16xbf16, #tpu.memory_space<vmem>>, vector<1x8x1x16xbf16>,
    %122 = vector.extract_strided_slice %97 {offsets = [0, 108], sizes = [8, 16], strides = [1, 1]} : vector<8x144xbf16> to vector<8x16xbf16>
    %c0_125 = arith.constant 0 : index
    %c0_126 = arith.constant 0 : index
    %c6 = arith.constant 6 : index
    %c0_127 = arith.constant 0 : index
    %123 = vector.load %arg5[%c0_125, %c0_126, %c6, %c0_127] : memref<1x8x16x16xbf16, #tpu.memory_space<vmem>>, vector<1x8x1x16xbf16>
    %124 = vector.shape_cast %123 : vector<1x8x1x16xbf16> to vector<8x16xbf16>
    %125 = vector.shape_cast %122 : vector<8x16xbf16> to vector<1x8x1x16xbf16>
    tpu.vector_store %arg5[%c0_125, %c0_126, %c6, %c0_127], %125 {strides = array<i32>} : memref<1x8x16x16xbf16, #tpu.memory_space<vmem>>, vector<1x8x1x16xbf16>,
    %126 = vector.extract_strided_slice %97 {offsets = [0, 126], sizes = [8, 16], strides = [1, 1]} : vector<8x144xbf16> to vector<8x16xbf16>
    %c0_128 = arith.constant 0 : index
    %c0_129 = arith.constant 0 : index
    %c7 = arith.constant 7 : index
    %c0_130 = arith.constant 0 : index
    %127 = vector.load %arg5[%c0_128, %c0_129, %c7, %c0_130] : memref<1x8x16x16xbf16, #tpu.memory_space<vmem>>, vector<1x8x1x16xbf16>
    %128 = vector.shape_cast %127 : vector<1x8x1x16xbf16> to vector<8x16xbf16>
    %129 = vector.shape_cast %126 : vector<8x16xbf16> to vector<1x8x1x16xbf16>
    tpu.vector_store %arg5[%c0_128, %c0_129, %c7, %c0_130], %129 {strides = array<i32>} : memref<1x8x16x16xbf16, #tpu.memory_space<vmem>>, vector<1x8x1x16xbf16>,
    %c0_131 = arith.constant 0 : index
    %c144_132 = arith.constant 144 : index
    %130 = vector.load %arg6[%c0_131, %c144_132] : memref<4x327xbf16, #tpu.memory_space<vmem>>, vector<4x144xbf16>
    %c0_133 = arith.constant 0 : index
    %c0_134 = arith.constant 0 : index
    %131 = vector.load %arg7[%c0_133, %c0_134] : memref<36x144xbf16, #tpu.memory_space<vmem>>, vector<4x144xbf16>
    tpu.vector_store %arg7[%c0_133, %c0_134], %130 {strides = array<i32>} : memref<36x144xbf16, #tpu.memory_space<vmem>>, vector<4x144xbf16>,
    %c0_135 = arith.constant 0 : index
    %c145_136 = arith.constant 145 : index
    %132 = vector.load %arg6[%c0_135, %c145_136] : memref<4x327xbf16, #tpu.memory_space<vmem>>, vector<4x144xbf16>
    %c4_137 = arith.constant 4 : index
    %c0_138 = arith.constant 0 : index
    %133 = vector.load %arg7[%c4_137, %c0_138] : memref<36x144xbf16, #tpu.memory_space<vmem>>, vector<4x144xbf16>
    tpu.vector_store %arg7[%c4_137, %c0_138], %132 {strides = array<i32>} : memref<36x144xbf16, #tpu.memory_space<vmem>>, vector<4x144xbf16>,
    %c0_139 = arith.constant 0 : index
    %c146 = arith.constant 146 : index
    %134 = vector.load %arg6[%c0_139, %c146] : memref<4x327xbf16, #tpu.memory_space<vmem>>, vector<4x144xbf16>
    %c8_140 = arith.constant 8 : index
    %c0_141 = arith.constant 0 : index
    %135 = vector.load %arg7[%c8_140, %c0_141] : memref<36x144xbf16, #tpu.memory_space<vmem>>, vector<4x144xbf16>
    tpu.vector_store %arg7[%c8_140, %c0_141], %134 {strides = array<i32>} : memref<36x144xbf16, #tpu.memory_space<vmem>>, vector<4x144xbf16>,
    %c0_142 = arith.constant 0 : index
    %c162 = arith.constant 162 : index
    %136 = vector.load %arg6[%c0_142, %c162] : memref<4x327xbf16, #tpu.memory_space<vmem>>, vector<4x144xbf16>
    %c12_143 = arith.constant 12 : index
    %c0_144 = arith.constant 0 : index
    %137 = vector.load %arg7[%c12_143, %c0_144] : memref<36x144xbf16, #tpu.memory_space<vmem>>, vector<4x144xbf16>
    tpu.vector_store %arg7[%c12_143, %c0_144], %136 {strides = array<i32>} : memref<36x144xbf16, #tpu.memory_space<vmem>>, vector<4x144xbf16>,
    %c0_145 = arith.constant 0 : index
    %c163_146 = arith.constant 163 : index
    %138 = vector.load %arg6[%c0_145, %c163_146] : memref<4x327xbf16, #tpu.memory_space<vmem>>, vector<4x144xbf16>
    %c16_147 = arith.constant 16 : index
    %c0_148 = arith.constant 0 : index
    %139 = vector.load %arg7[%c16_147, %c0_148] : memref<36x144xbf16, #tpu.memory_space<vmem>>, vector<4x144xbf16>
    tpu.vector_store %arg7[%c16_147, %c0_148], %138 {strides = array<i32>} : memref<36x144xbf16, #tpu.memory_space<vmem>>, vector<4x144xbf16>,
    %c0_149 = arith.constant 0 : index
    %c164 = arith.constant 164 : index
    %140 = vector.load %arg6[%c0_149, %c164] : memref<4x327xbf16, #tpu.memory_space<vmem>>, vector<4x144xbf16>
    %c20_150 = arith.constant 20 : index
    %c0_151 = arith.constant 0 : index
    %141 = vector.load %arg7[%c20_150, %c0_151] : memref<36x144xbf16, #tpu.memory_space<vmem>>, vector<4x144xbf16>
    tpu.vector_store %arg7[%c20_150, %c0_151], %140 {strides = array<i32>} : memref<36x144xbf16, #tpu.memory_space<vmem>>, vector<4x144xbf16>,
    %c0_152 = arith.constant 0 : index
    %c180 = arith.constant 180 : index
    %142 = vector.load %arg6[%c0_152, %c180] : memref<4x327xbf16, #tpu.memory_space<vmem>>, vector<4x144xbf16>
    %c24_153 = arith.constant 24 : index
    %c0_154 = arith.constant 0 : index
    %143 = vector.load %arg7[%c24_153, %c0_154] : memref<36x144xbf16, #tpu.memory_space<vmem>>, vector<4x144xbf16>
    tpu.vector_store %arg7[%c24_153, %c0_154], %142 {strides = array<i32>} : memref<36x144xbf16, #tpu.memory_space<vmem>>, vector<4x144xbf16>,
    %c0_155 = arith.constant 0 : index
    %c181_156 = arith.constant 181 : index
    %144 = vector.load %arg6[%c0_155, %c181_156] : memref<4x327xbf16, #tpu.memory_space<vmem>>, vector<4x144xbf16>
    %c28_157 = arith.constant 28 : index
    %c0_158 = arith.constant 0 : index
    %145 = vector.load %arg7[%c28_157, %c0_158] : memref<36x144xbf16, #tpu.memory_space<vmem>>, vector<4x144xbf16>
    tpu.vector_store %arg7[%c28_157, %c0_158], %144 {strides = array<i32>} : memref<36x144xbf16, #tpu.memory_space<vmem>>, vector<4x144xbf16>,
    %c0_159 = arith.constant 0 : index
    %c182 = arith.constant 182 : index
    %146 = vector.load %arg6[%c0_159, %c182] : memref<4x327xbf16, #tpu.memory_space<vmem>>, vector<4x144xbf16>
    %c32_160 = arith.constant 32 : index
    %c0_161 = arith.constant 0 : index
    %147 = vector.load %arg7[%c32_160, %c0_161] : memref<36x144xbf16, #tpu.memory_space<vmem>>, vector<4x144xbf16>
    tpu.vector_store %arg7[%c32_160, %c0_161], %146 {strides = array<i32>} : memref<36x144xbf16, #tpu.memory_space<vmem>>, vector<4x144xbf16>,
    %c0_162 = arith.constant 0 : index
    %c0_163 = arith.constant 0 : index
    %148 = vector.load %arg2[%c0_162, %c0_163] : memref<8x36xbf16, #tpu.memory_space<vmem>>, vector<8x36xbf16>
    %c0_164 = arith.constant 0 : index
    %c0_165 = arith.constant 0 : index
    %149 = vector.load %arg7[%c0_164, %c0_165] : memref<36x144xbf16, #tpu.memory_space<vmem>>, vector<36x144xbf16>
    %cst_166 = arith.constant dense<0.000000e+00> : vector<8x144xf32>
    %150 = tpu.matmul %148, %149, %cst_166 {dimension_numbers = #tpu.dot_dimension_numbers<[1], [0], [0], [1], [0, 0, 1, 1], [], []>} : vector<8x36xbf16>, vector<36x144xbf16>, vector<8x144xf32> -> vector<8x144xf32>
    %c0_167 = arith.constant 0 : index
    %c0_168 = arith.constant 0 : index
    %151 = vector.load %arg3[%c0_167, %c0_168] : memref<8x1xf32, #tpu.memory_space<vmem>>, vector<8x1xf32>
    %152 = vector.broadcast %151 : vector<8x1xf32> to vector<8x144xf32>
    %153 = arith.mulf %150, %152 : vector<8x144xf32>
    %c0_169 = arith.constant 0 : index
    %c0_170 = arith.constant 0 : index
    %154 = vector.load %arg4[%c0_169, %c0_170] : memref<8x1xf32, #tpu.memory_space<vmem>>, vector<8x1xf32>
    %155 = vector.broadcast %154 : vector<8x1xf32> to vector<8x144xf32>
    %156 = arith.addf %153, %155 : vector<8x144xf32>
    %cst_171 = arith.constant 0.000000e+00 : f32
    %157 = vector.broadcast %cst_171 : f32 to vector<8x144xf32>
    %158 = arith.maximumf %156, %157 : vector<8x144xf32>
    %159 = arith.truncf %158 : vector<8x144xf32> to vector<8x144xbf16>
    %160 = vector.extract_strided_slice %159 {offsets = [0, 0], sizes = [8, 16], strides = [1, 1]} : vector<8x144xbf16> to vector<8x16xbf16>
    %c0_172 = arith.constant 0 : index
    %c0_173 = arith.constant 0 : index
    %c8_174 = arith.constant 8 : index
    %c0_175 = arith.constant 0 : index
    %161 = vector.load %arg5[%c0_172, %c0_173, %c8_174, %c0_175] : memref<1x8x16x16xbf16, #tpu.memory_space<vmem>>, vector<1x8x1x16xbf16>
    %162 = vector.shape_cast %161 : vector<1x8x1x16xbf16> to vector<8x16xbf16>
    %163 = vector.shape_cast %160 : vector<8x16xbf16> to vector<1x8x1x16xbf16>
    tpu.vector_store %arg5[%c0_172, %c0_173, %c8_174, %c0_175], %163 {strides = array<i32>} : memref<1x8x16x16xbf16, #tpu.memory_space<vmem>>, vector<1x8x1x16xbf16>,
    %164 = vector.extract_strided_slice %159 {offsets = [0, 18], sizes = [8, 16], strides = [1, 1]} : vector<8x144xbf16> to vector<8x16xbf16>
    %c0_176 = arith.constant 0 : index
    %c0_177 = arith.constant 0 : index
    %c9 = arith.constant 9 : index
    %c0_178 = arith.constant 0 : index
    %165 = vector.load %arg5[%c0_176, %c0_177, %c9, %c0_178] : memref<1x8x16x16xbf16, #tpu.memory_space<vmem>>, vector<1x8x1x16xbf16>
    %166 = vector.shape_cast %165 : vector<1x8x1x16xbf16> to vector<8x16xbf16>
    %167 = vector.shape_cast %164 : vector<8x16xbf16> to vector<1x8x1x16xbf16>
    tpu.vector_store %arg5[%c0_176, %c0_177, %c9, %c0_178], %167 {strides = array<i32>} : memref<1x8x16x16xbf16, #tpu.memory_space<vmem>>, vector<1x8x1x16xbf16>,
    %168 = vector.extract_strided_slice %159 {offsets = [0, 36], sizes = [8, 16], strides = [1, 1]} : vector<8x144xbf16> to vector<8x16xbf16>
    %c0_179 = arith.constant 0 : index
    %c0_180 = arith.constant 0 : index
    %c10 = arith.constant 10 : index
    %c0_181 = arith.constant 0 : index
    %169 = vector.load %arg5[%c0_179, %c0_180, %c10, %c0_181] : memref<1x8x16x16xbf16, #tpu.memory_space<vmem>>, vector<1x8x1x16xbf16>
    %170 = vector.shape_cast %169 : vector<1x8x1x16xbf16> to vector<8x16xbf16>
    %171 = vector.shape_cast %168 : vector<8x16xbf16> to vector<1x8x1x16xbf16>
    tpu.vector_store %arg5[%c0_179, %c0_180, %c10, %c0_181], %171 {strides = array<i32>} : memref<1x8x16x16xbf16, #tpu.memory_space<vmem>>, vector<1x8x1x16xbf16>,
    %172 = vector.extract_strided_slice %159 {offsets = [0, 54], sizes = [8, 16], strides = [1, 1]} : vector<8x144xbf16> to vector<8x16xbf16>
    %c0_182 = arith.constant 0 : index
    %c0_183 = arith.constant 0 : index
    %c11 = arith.constant 11 : index
    %c0_184 = arith.constant 0 : index
    %173 = vector.load %arg5[%c0_182, %c0_183, %c11, %c0_184] : memref<1x8x16x16xbf16, #tpu.memory_space<vmem>>, vector<1x8x1x16xbf16>
    %174 = vector.shape_cast %173 : vector<1x8x1x16xbf16> to vector<8x16xbf16>
    %175 = vector.shape_cast %172 : vector<8x16xbf16> to vector<1x8x1x16xbf16>
    tpu.vector_store %arg5[%c0_182, %c0_183, %c11, %c0_184], %175 {strides = array<i32>} : memref<1x8x16x16xbf16, #tpu.memory_space<vmem>>, vector<1x8x1x16xbf16>,
    %176 = vector.extract_strided_slice %159 {offsets = [0, 72], sizes = [8, 16], strides = [1, 1]} : vector<8x144xbf16> to vector<8x16xbf16>
    %c0_185 = arith.constant 0 : index
    %c0_186 = arith.constant 0 : index
    %c12_187 = arith.constant 12 : index
    %c0_188 = arith.constant 0 : index
    %177 = vector.load %arg5[%c0_185, %c0_186, %c12_187, %c0_188] : memref<1x8x16x16xbf16, #tpu.memory_space<vmem>>, vector<1x8x1x16xbf16>
    %178 = vector.shape_cast %177 : vector<1x8x1x16xbf16> to vector<8x16xbf16>
    %179 = vector.shape_cast %176 : vector<8x16xbf16> to vector<1x8x1x16xbf16>
    tpu.vector_store %arg5[%c0_185, %c0_186, %c12_187, %c0_188], %179 {strides = array<i32>} : memref<1x8x16x16xbf16, #tpu.memory_space<vmem>>, vector<1x8x1x16xbf16>,
    %180 = vector.extract_strided_slice %159 {offsets = [0, 90], sizes = [8, 16], strides = [1, 1]} : vector<8x144xbf16> to vector<8x16xbf16>
    %c0_189 = arith.constant 0 : index
    %c0_190 = arith.constant 0 : index
    %c13 = arith.constant 13 : index
    %c0_191 = arith.constant 0 : index
    %181 = vector.load %arg5[%c0_189, %c0_190, %c13, %c0_191] : memref<1x8x16x16xbf16, #tpu.memory_space<vmem>>, vector<1x8x1x16xbf16>
    %182 = vector.shape_cast %181 : vector<1x8x1x16xbf16> to vector<8x16xbf16>
    %183 = vector.shape_cast %180 : vector<8x16xbf16> to vector<1x8x1x16xbf16>
    tpu.vector_store %arg5[%c0_189, %c0_190, %c13, %c0_191], %183 {strides = array<i32>} : memref<1x8x16x16xbf16, #tpu.memory_space<vmem>>, vector<1x8x1x16xbf16>,
    %184 = vector.extract_strided_slice %159 {offsets = [0, 108], sizes = [8, 16], strides = [1, 1]} : vector<8x144xbf16> to vector<8x16xbf16>
    %c0_192 = arith.constant 0 : index
    %c0_193 = arith.constant 0 : index
    %c14 = arith.constant 14 : index
    %c0_194 = arith.constant 0 : index
    %185 = vector.load %arg5[%c0_192, %c0_193, %c14, %c0_194] : memref<1x8x16x16xbf16, #tpu.memory_space<vmem>>, vector<1x8x1x16xbf16>
    %186 = vector.shape_cast %185 : vector<1x8x1x16xbf16> to vector<8x16xbf16>
    %187 = vector.shape_cast %184 : vector<8x16xbf16> to vector<1x8x1x16xbf16>
    tpu.vector_store %arg5[%c0_192, %c0_193, %c14, %c0_194], %187 {strides = array<i32>} : memref<1x8x16x16xbf16, #tpu.memory_space<vmem>>, vector<1x8x1x16xbf16>,
    %188 = vector.extract_strided_slice %159 {offsets = [0, 126], sizes = [8, 16], strides = [1, 1]} : vector<8x144xbf16> to vector<8x16xbf16>
    %c0_195 = arith.constant 0 : index
    %c0_196 = arith.constant 0 : index
    %c15 = arith.constant 15 : index
    %c0_197 = arith.constant 0 : index
    %189 = vector.load %arg5[%c0_195, %c0_196, %c15, %c0_197] : memref<1x8x16x16xbf16, #tpu.memory_space<vmem>>, vector<1x8x1x16xbf16>
    %190 = vector.shape_cast %189 : vector<1x8x1x16xbf16> to vector<8x16xbf16>
    %191 = vector.shape_cast %188 : vector<8x16xbf16> to vector<1x8x1x16xbf16>
    tpu.vector_store %arg5[%c0_195, %c0_196, %c15, %c0_197], %191 {strides = array<i32>} : memref<1x8x16x16xbf16, #tpu.memory_space<vmem>>, vector<1x8x1x16xbf16>,
    return
  }
  func.func @transform_0(%arg0: i32) -> (i32, i32, i32) {
    %c0_i32 = arith.constant 0 : i32
    %c0_i32_0 = arith.constant 0 : i32
    %c0_i32_1 = arith.constant 0 : i32
    return %arg0, %c0_i32, %c0_i32_0 : i32, i32, i32
  }
  func.func @transform_1(%arg0: i32) -> (i32, i32) {
    %c0_i32 = arith.constant 0 : i32
    %c0_i32_0 = arith.constant 0 : i32
    %c0_i32_1 = arith.constant 0 : i32
    return %c0_i32, %c0_i32_0 : i32, i32
  }
  func.func @transform_2(%arg0: i32) -> (i32, i32) {
    %c0_i32 = arith.constant 0 : i32
    %c0_i32_0 = arith.constant 0 : i32
    %c0_i32_1 = arith.constant 0 : i32
    return %c0_i32, %c0_i32_0 : i32, i32
  }
  func.func @transform_3(%arg0: i32) -> (i32, i32) {
    %c0_i32 = arith.constant 0 : i32
    %c0_i32_0 = arith.constant 0 : i32
    %c0_i32_1 = arith.constant 0 : i32
    return %c0_i32, %c0_i32_0 : i32, i32
  }
  func.func @transform_4(%arg0: i32) -> (i32, i32, i32, i32) {
    %c0_i32 = arith.constant 0 : i32
    %c0_i32_0 = arith.constant 0 : i32
    %c0_i32_1 = arith.constant 0 : i32
    %c0_i32_2 = arith.constant 0 : i32
    return %arg0, %c0_i32, %c0_i32_0, %c0_i32_1 : i32, i32, i32, i32
  }
}

</mosaic_0001>

<bundles_post_ra>
// kernel: tpu_custom_call.1
= control target key start
LH: loop header
LB: loop body
LE: loop exit
PB: predicated region body
PF: predicated region fallthrough
CT: control target
= control target key end

     0   :  { %9 = vsyncpa [#allocation5], 0  ;;  %s3570_s0 = inlined_call_operand.vmem [shape: bf16[2,4,256], index: 0, kind: input, shape index: {}]   ;;  %s3571_s1 = inlined_call_operand.vmem [shape: bf16[8,36], index: 1, kind: input, shape index: {}]   ;;  %s3572_s2 = inlined_call_operand.vmem [shape: f32[8,1], index: 2, kind: input, shape index: {}]   ;;  %s3573_s3 = inlined_call_operand.vmem [shape: f32[8,1], index: 3, kind: input, shape index: {}]   ;;  %s3574_s4 = inlined_call_operand.hbm [shape: bf16[2,8,16,16], index: 4, kind: output, shape index: {}]  }
   0x1   :  { %11 = vsyncpa [#allocation5 + $0x1], 0  ;;  %s2396_s15 = smov 0   ;;  %s2398_s16 = smov 0  }
   0x2   :  { %s2400_s17 = smov 0   ;;  %s2402_s18 = smov 0  }
   0x3 LB: > { %s2417_s19 = sadd.s32 4294967295, %s2327_s18   ;;  %s2106_s20 = sadd.s32 4294967294, %s2327_s18   ;;  %s2327_s18 = sphi %s2402_s18, %s3600_s18   ;;  %s2323_s17 = sphi %s2400_s17, %s3599_s17   ;;  %s2319_s16 = sphi %s2398_s16, %s3598_s16   ;;  %s2315_s15 = sphi %s2396_s15, %s3597_s15  }
   0x4   : > { %s2421_s21 = sadd.s32 1, %s2327_s18   ;;  %s113_s22 = sadd.s32 1, %s2323_s17 }
   0x5   : > { %s110_s23 = ssub.s32 %s2327_s18, %s2421_s21  ;;  %p123_p0 = scmp.ne.s32.totalorder %s2323_s17, %s2319_s16 }
   0x6   : > { %p111_p1 = scmp.eq.s32.totalorder %s110_s23, 0  ;;  %p124_p2 = scmp.eq.s32.totalorder %s2417_s19, 1 }
   0x7   : > { %p129_p3 = scmp.ne.s32.totalorder %s2319_s16, %s2315_s15  ;;  %p130_p4 = scmp.eq.s32.totalorder %s2106_s20, 1 }
   0x8   : > { %s2432_s24 = scalar_select %p111_p1, %s2323_s17, %s113_s22  }
   0x9   : > { %p2434_p5 = por %p124_p2, %p123_p0  ;;  %p2438_p6 = por %p130_p4, %p129_p3 }
   0xa   : > { %p2109_p7 = scmp.ge.s32.totalorder %s2327_s18, 1  ;;  %p165_p8 = scmp.lt.s32.totalorder %s2327_s18, 3 }
   0xc   : > { %p166_p9 = pnand %p2109_p7, %p165_p8 }
   0xd   : > { %p191_p10 = scmp.lt.s32.totalorder (!%p166_p9), %s2417_s19, 1  ;;  %vm197_vm0 = vcmask (!%p166_p9), 148480   ;;  %v2329_v0 = vmov (!%p166_p9), 0   ;;  %s2330_s6 = smov (!%p166_p9), 23   ;;  %vm199_vm1 = vcmask (!%p166_p9), 574856   ;;  %vm206_vm2 = vcmask (!%p166_p9), 279704  }
   0xe   : > { %169 = sbr.rel (%p166_p9) target bundleno = 907 (0x38b), region = 36  ;;  %198 = vst.msk [vmem:[#allocation2] sm:$0x3] (!%p166_p9), %vm197_vm0, %v2329_v0  ;;  %575 = vmatprep.mubr.bf16.mxu0 (!%p166_p9), %v2329_v0  ;;  %1422 = vmatprep.mubr.bf16.mxu1 (!%p166_p9), %v2329_v0  ;;  %s2331_s7 = smov (!%p166_p9), 19   ;;  %vm208_vm3 = vcmask (!%p166_p9), 296216   ;;  %vm215_vm4 = vcmask (!%p166_p9), 427304   ;;  %v373_v37 = vlaneseq (!%p166_p9) }
   0xf   : > { %2244 = vset.pattern.permute.xlu1 (!%p166_p9), %v2329_v0  ;;  %2245 = vset.pattern.permute.xlu0 (!%p166_p9), %v2329_v0  ;;  %s2332_s8 = smov (!%p166_p9), 25   ;;  %s2333_s9 = smov (!%p166_p9), 21   ;;  %200 = vst.msk [vmem:[#allocation2 + $0x4] sm:$0x3] (!%p166_p9), %vm199_vm1, %v2329_v0  ;;  %vm217_vm5 = vcmask (!%p166_p9), 443816   ;;  %vm224_vm6 = vcmask (!%p166_p9), 574904  }
  0x10   : > { %s2334_s10 = smov (!%p166_p9), 31   ;;  %s2335_s11 = smov (!%p166_p9), 27   ;;  %vm226_vm7 = vcmask (!%p166_p9), 591416   ;;  %vm233_vm8 = vcmask (!%p166_p9), 722504   ;;  %vm235_vm9 = vcmask (!%p166_p9), 739016   ;;  %vm242_vm10 = vcmask (!%p166_p9), 870104  }
  0x11   : > { %s2336_s12 = smov (!%p166_p9), 29   ;;  %s2337_s13 = smov (!%p166_p9), 33   ;;  %vm244_vm11 = vcmask (!%p166_p9), 886616   ;;  %vm263_vm12 = vcmask (!%p166_p9), 1042424   ;;  %vm264_vm13 = vcmask (!%p166_p9), 117762   ;;  %vm251_vm14 = vcmask (!%p166_p9), 1017704  }
  0x12   : > { %s2338_s14 = smov (!%p166_p9), 35   ;;  %s2339_s20 = smov (!%p166_p9), 37   ;;  %vm260_vm15 = vcmask (!%p166_p9), 252928   ;;  %vm253_vm0 = vcmask (!%p166_p9), 1034216   ;;  %vm265_vm1 = vmor (!%p166_p9), %vm264_vm13, %vm263_vm12  ;;  %vm312_vm12 = vcmask (!%p166_p9), 870216   ;;  %vm331_vm13 = vcmask (!%p166_p9), 1042408  }
  0x13   : > { %s2340_s22 = smov (!%p166_p9), 39   ;;  %s2341_s23 = smov (!%p166_p9), 41   ;;  %v2346_v35 = vmov (!%p166_p9), 1983009808   ;;  %v2487_v41 = vshrl.u32 (!%p166_p9), %v373_v37, 7  ;;  %v584_v62 = vld [vmem:[%s3572_s2] sm:$0xff] (!%p166_p9) }
  0x14   : > { %s2344_s29 = smov (!%p166_p9), 47   ;;  %s2345_s30 = smov (!%p166_p9), 49   ;;  %v371_v36 = vunpack.c.l.s4 (!%p166_p9), %v2346_v35  ;;  %v592_v63 = vld [vmem:[%s3573_s3] sm:$0xff] (!%p166_p9)  ;;  %v2362_v42 = vmov (!%p166_p9), 1966171168  }
  0x15   : > { %s192_s27 = scalar_select %p191_p10, %s2417_s19, 1 }
  0x16   : > { %v372_v40 = vunpack.c.0.s8 %v371_v36 }
  0x17   : > { %s2162_s28 = sshll.u32 %s192_s27, 2  ;;  %s2342_s27 = smov 45  }
  0x18   : > { %s2454_s5 = scalar_lea.vmem %s3570_s0, %s2162_s28  ;;  %s2343_s28 = smov 43   ;;  %v375_v43 = vsub.s32 %v372_v40, %v2487_v41 }
  0x19   : > { %v219_v1 = vld [vmem:[%s2454_s5] sm:$0x3]  ;;  %v278_v9 = vld [vmem:[%s2454_s5 + $0x2] sm:$0x3] }
  0x1a   : > { %v201_v2 = vld [vmem:[%s2454_s5] sm:$0x3]  ;;  %221 = vrot.lane.b32.xlu1 %v219_v1, %s2330_s6  ;;  %v287_v10 = vld [vmem:[%s2454_s5 + $0x2] sm:$0x3]  ;;  %s2348_s6 = smov 109  }
  0x1b   : > { %203 = vrot.lane.b32.xlu0 %v201_v2, %s2331_s7  ;;  %v228_v3 = vld [vmem:[%s2454_s5] sm:$0x3]  ;;  %v296_v11 = vld [vmem:[%s2454_s5 + $0x2] sm:$0x3]  ;;  %s2349_s7 = smov 127  }
  0x1c   : > { %v210_v4 = vld [vmem:[%s2454_s5] sm:$0x3]  ;;  %v305_v12 = vld [vmem:[%s2454_s5 + $0x2] sm:$0x3] }
  0x1d   : > { %v255_v5 = vld [vmem:[%s2454_s5] sm:$0x3]  ;;  %v323_v13 = vld [vmem:[%s2454_s5 + $0x2] sm:$0x3] }
  0x1e   : > { %230 = vrot.lane.b32.xlu1 %v228_v3, %s2332_s8  ;;  %v237_v6 = vld [vmem:[%s2454_s5] sm:$0x3]  ;;  %v314_v14 = vld [vmem:[%s2454_s5 + $0x2] sm:$0x3]  ;;  %s2350_s8 = smov 92  }
  0x1f   : > { %212 = vrot.lane.b32.xlu0 %v210_v4, %s2333_s9  ;;  %v246_v7 = vld [vmem:[%s2454_s5] sm:$0x3]  ;;  %v337_v15 = vld [vmem:[%s2454_s5 + $0x2] sm:$0x3]  ;;  %s2351_s9 = smov 110  }
  0x20   : > { %v269_v8 = vld [vmem:[%s2454_s5] sm:$0x3]  ;;  %v346_v16 = vld [vmem:[%s2454_s5 + $0x2] sm:$0x3]  ;;  %s2347_s5 = smov 126  }
  0x22   : > { %257 = vrot.lane.b32.xlu1 %v255_v5, %s2334_s10  ;;  %s2352_s10 = smov 90  }
  0x23   : > { %239 = vrot.lane.b32.xlu0 %v237_v6, %s2335_s11  ;;  %s2353_s11 = smov 108  }
  0x26   : > { %271 = vrot.lane.b32.xlu1 %v269_v8, %s2337_s13  ;;  %s2355_s13 = smov 111  }
  0x27   : > { %248 = vrot.lane.b32.xlu0 %v246_v7, %s2336_s12  ;;  %s2354_s12 = smov 91  }
  0x2a   : > { %289 = vrot.lane.b32.xlu1 %v287_v10, %s2339_s20  ;;  %s2357_s20 = smov 112  }
  0x2b   : > { %280 = vrot.lane.b32.xlu0 %v278_v9, %s2338_s14  ;;  %s2356_s14 = smov 94  }
  0x2e   : > { %307 = vrot.lane.b32.xlu1 %v305_v12, %s2341_s23  ;;  %s2359_s23 = smov 93  }
  0x2f   : > { %298 = vrot.lane.b32.xlu0 %v296_v11, %s2340_s22  ;;  %s2358_s22 = smov 75  }
  0x32   : > { %316 = vrot.lane.b32.xlu1 %v314_v14, %s2343_s28  ;;  %s2361_s28 = smov 74  }
  0x33   : > { %325 = vrot.lane.b32.xlu0 %v323_v13, %s2342_s27  ;;  %s2360_s27 = smov 76  }
  0x36   : > { %348 = vrot.lane.b32.xlu1 %v346_v16, %s2345_s30 }
  0x37   : > { %339 = vrot.lane.b32.xlu0 %v337_v15, %s2344_s29  ;;  %s2367_s29 = smov 2  }
  0x8c   : > { %v222_v17 = vpop.permute.xlu1 %221 }
  0x8d   : > { %v204_v18 = vpop.permute.xlu0 %203 }
  0x8e   : > { %207 = vst.msk [vmem:[#allocation2] sm:$0x3] %vm206_vm2, %v204_v18  ;;  %vm267_vm2 = vcmask 132216  }
  0x8f   : > { %209 = vst.msk [vmem:[#allocation2] sm:$0x3] %vm208_vm3, %v2329_v0  ;;  %vm274_vm3 = vcmask 263304  }
  0x90   : > { %v231_v19 = vpop.permute.xlu1 %230 }
  0x91   : > { %v213_v20 = vpop.permute.xlu0 %212 }
  0x92   : > { %216 = vst.msk [vmem:[#allocation2] sm:$0x3] %vm215_vm4, %v213_v20  ;;  %vm276_vm4 = vcmask 279816  }
  0x93   : > { %218 = vst.msk [vmem:[#allocation2] sm:$0x3] %vm217_vm5, %v2329_v0  ;;  %vm283_vm5 = vcmask 410904  }
  0x94   : > { %225 = vst.msk [vmem:[#allocation2] sm:$0x3] %vm224_vm6, %v222_v17  ;;  %v258_v21 = vpop.permute.xlu1 %257  ;;  %vm285_vm6 = vcmask 427416  }
  0x95   : > { %227 = vst.msk [vmem:[#allocation2] sm:$0x3] %vm226_vm7, %v2329_v0  ;;  %v240_v22 = vpop.permute.xlu0 %239  ;;  %v259_v23 = vrot.slane %v258_v21, 6  ;;  %vm292_vm7 = vcmask 558504  }
  0x96   : > { %234 = vst.msk [vmem:[#allocation2] sm:$0x3] %vm233_vm8, %v231_v19  ;;  %vm294_vm8 = vcmask 575016  }
  0x97   : > { %236 = vst.msk [vmem:[#allocation2] sm:$0x3] %vm235_vm9, %v2329_v0  ;;  %v261_v26 = vsel %vm260_vm15, %v259_v23, %v258_v21  ;;  %vm301_vm9 = vcmask 706104   ;;  %vm328_vm15 = vcmask 367616  }
  0x98   : > { %243 = vst.msk [vmem:[#allocation2] sm:$0x3] %vm242_vm10, %v240_v22  ;;  %v272_v25 = vpop.permute.xlu1 %271  ;;  %vm303_vm10 = vcmask 722616  }
  0x99   : > { %245 = vst.msk [vmem:[#allocation2] sm:$0x3] %vm244_vm11, %v2329_v0  ;;  %v249_v24 = vpop.permute.xlu0 %248  ;;  %vm310_vm11 = vcmask 853704  }
  0x9a   : > { %252 = vst.msk [vmem:[#allocation2] sm:$0x3] %vm251_vm14, %v249_v24  ;;  %vm332_vm14 = vcmask 101378  }
  0x9b   : > { %254 = vst.msk [vmem:[#allocation2] sm:$0x3] %vm253_vm0, %v2329_v0  ;;  %vm319_vm0 = vcmask 1001304  }
  0x9c   : > { %266 = vst.msk [vmem:[#allocation2] sm:$0xf] %vm265_vm1, %v261_v26  ;;  %v290_v28 = vpop.permute.xlu1 %289  ;;  %vm321_vm1 = vcmask 1017816  }
  0x9d   : > { %268 = vst.msk [vmem:[#allocation2 + $0x2] sm:$0x3] %vm267_vm2, %v2329_v0  ;;  %v281_v27 = vpop.permute.xlu0 %280  ;;  %vm333_vm2 = vmor %vm332_vm14, %vm331_vm13  ;;  %vm432_vm13 = vcmask 891904   ;;  %vm380_vm14 = vcmask 1039360  }
  0x9e   : > { %275 = vst.msk [vmem:[#allocation2 + $0x2] sm:$0x3] %vm274_vm3, %v272_v25  ;;  %vm335_vm3 = vcmask 115816  }
  0x9f   : > { %277 = vst.msk [vmem:[#allocation2 + $0x2] sm:$0x3] %vm276_vm4, %v2329_v0  ;;  %vm342_vm4 = vcmask 246904  }
  0xa0   : > { %284 = vst.msk [vmem:[#allocation2 + $0x2] sm:$0x3] %vm283_vm5, %v281_v27  ;;  %v308_v30 = vpop.permute.xlu1 %307  ;;  %vm344_vm5 = vcmask 263416  }
  0xa1   : > { %286 = vst.msk [vmem:[#allocation2 + $0x2] sm:$0x3] %vm285_vm6, %v2329_v0  ;;  %v299_v29 = vpop.permute.xlu0 %298  ;;  %vm351_vm6 = vcmask 394504  }
  0xa2   : > { %293 = vst.msk [vmem:[#allocation2 + $0x2] sm:$0x3] %vm292_vm7, %v290_v28  ;;  %vm363_vm7 = vcmask 1041408  }
  0xa3   : > { %295 = vst.msk [vmem:[#allocation2 + $0x2] sm:$0x3] %vm294_vm8, %v2329_v0  ;;  %vm364_vm8 = vcmask 128004   ;;  %v2246_v45 = vld [vmem:[#allocation2] ss:$0 sps:$4 sm:$0xff]  }
  0xa4   : > { %302 = vst.msk [vmem:[#allocation2 + $0x2] sm:$0x3] %vm301_vm9, %v299_v29  ;;  %v317_v32 = vpop.permute.xlu1 %316  ;;  %vm2491_vm9 = vmor %vm364_vm8, %vm363_vm7  ;;  %v376_v46 = vrot.slane %v2246_v45, %v375_v43  ;;  %v2247_v47 = vld [vmem:[#allocation2] ss:$0 sps:$4 sm:$0xff]   ;;  %vm1216_vm8 = vcmask 916480  }
  0xa5   : > { %304 = vst.msk [vmem:[#allocation2 + $0x2] sm:$0x3] %vm303_vm10, %v2329_v0  ;;  %v326_v31 = vpop.permute.xlu0 %325  ;;  %v412_v48 = vrot.slane %v2247_v47, %v375_v43  ;;  %v2248_v49 = vld [vmem:[#allocation2] ss:$0 sps:$4 sm:$0xff]   ;;  %vm399_vm10 = vcmask 1031168  }
  0xa6   : > { %311 = vst.msk [vmem:[#allocation2 + $0x2] sm:$0x3] %vm310_vm11, %v308_v30  ;;  %v327_v33 = vrot.slane %v326_v31, 6  ;;  %377 = vrot.lane.b32.xlu0 %v376_v46, %s2349_s7  ;;  %v445_v50 = vrot.slane %v2248_v49, %v375_v43  ;;  %v2249_v51 = vld [vmem:[#allocation2] ss:$0 sps:$4 sm:$0xff]   ;;  %vm383_vm11 = vcmask 1043458  }
  0xa7   : > { %313 = vst.msk [vmem:[#allocation2 + $0x2] sm:$0x3] %vm312_vm12, %v2329_v0  ;;  %v478_v53 = vrot.slane %v2249_v51, %v375_v43  ;;  %vm384_vm12 = vcmask 130054   ;;  %s2368_s7 = smov [#allocation4]  }
  0xa8   : > { %v329_v34 = vsel %vm328_vm15, %v327_v33, %v326_v31  ;;  %320 = vst.msk [vmem:[#allocation2 + $0x2] sm:$0x3] %vm319_vm0, %v317_v32  ;;  %v349_v39 = vpop.permute.xlu1 %348  ;;  %vm2511_vm15 = vmor %vm384_vm12, %vm383_vm11  ;;  %vm465_vm0 = vcmask 752640   ;;  %vm1281_vm11 = vcmask 760832   ;;  %vm1313_vm12 = vcmask 621568  }
  0xa9   : > { %322 = vst.msk [vmem:[#allocation2 + $0x2] sm:$0x3] %vm321_vm1, %v2329_v0  ;;  %v340_v38 = vpop.permute.xlu0 %339  ;;  %vm416_vm1 = vcmask 900096  }
  0xaa   : > { %334 = vst.msk [vmem:[#allocation2 + $0x2] sm:$0xf] %vm333_vm2, %v329_v34  ;;  %413 = vrot.lane.b32.xlu0 %v412_v48, %s2351_s9  ;;  %vm498_vm2 = vcmask 736256  }
  0xab   : > { %336 = vst.msk [vmem:[#allocation2 + $0x4] sm:$0x3] %vm335_vm3, %v2329_v0  ;;  %vm449_vm3 = vcmask 883712  }
  0xac   : > { %343 = vst.msk [vmem:[#allocation2 + $0x4] sm:$0x3] %vm342_vm4, %v340_v38  ;;  %vm1233_vm4 = vcmask 908288  }
  0xad   : > { %345 = vst.msk [vmem:[#allocation2 + $0x4] sm:$0x3] %vm344_vm5, %v2329_v0  ;;  %vm482_vm5 = vcmask 744448  }
  0xae   : > { %352 = vst.msk [vmem:[#allocation2 + $0x4] sm:$0x3] %vm351_vm6, %v349_v39  ;;  %446 = vrot.lane.b32.xlu0 %v445_v50, %s2353_s11  ;;  %vm1265_vm6 = vcmask 769024  }
  0xb1   : > { %v2114_v44 = vld.sshfl [vmem:[#allocation2] sm:$0x33 pattern:$0x76325410] }
  0xb2   : > { %396 = vrot.lane.b32.xlu1 %v2114_v44, %s2347_s5  ;;  %366 = vst.msk [vmem:[#allocation3] sm:$0x33] %vm2491_vm9, %v2114_v44  ;;  %v2250_v52 = vld [vmem:[#allocation2 + $0x2] ss:$0 sps:$4 sm:$0xff]   ;;  %479 = vrot.lane.b32.xlu0 %v478_v53, %s2354_s12 }
  0xb3   : > { %v1229_v54 = vrot.slane %v2250_v52, %v375_v43  ;;  %v2251_v55 = vld [vmem:[#allocation2 + $0x2] ss:$0 sps:$4 sm:$0xff]  }
  0xb4   : > { %v1261_v56 = vrot.slane %v2251_v55, %v375_v43  ;;  %v2252_v57 = vld [vmem:[#allocation2 + $0x2] ss:$0 sps:$4 sm:$0xff]  }
  0xb5   : > { %v2135_v58 = vld.sshfl [vmem:[#allocation2 + $0x2] sm:$0x33 pattern:$0x76325410]  ;;  %v1294_v59 = vrot.slane %v2252_v57, %v375_v43 }
  0xb6   : > { %429 = vrot.lane.b32.xlu1 %v2114_v44, %s2348_s6  ;;  %1213 = vrot.lane.b32.xlu0 %v2135_v58, %s2357_s20  ;;  %v2253_v60 = vld [vmem:[#allocation2 + $0x2] ss:$0 sps:$4 sm:$0xff]  }
  0xb7   : > { %v1326_v61 = vrot.slane %v2253_v60, %v375_v43 }
  0xba   : > { %462 = vrot.lane.b32.xlu1 %v2114_v44, %s2350_s8  ;;  %1246 = vrot.lane.b32.xlu0 %v2135_v58, %s2351_s9 }
  0xbe   : > { %495 = vrot.lane.b32.xlu1 %v2114_v44, %s2352_s10  ;;  %1278 = vrot.lane.b32.xlu0 %v2135_v58, %s2359_s23  ;;  %s2365_s23 = smov 38   ;;  %s2269_s10 = sshll.u32 %s2368_s7, 4  ;;  %s2270_s10 = int_to_ptr.vmem [resolvable:$false] %s2269_s10 }
  0xbf   : > { %s2271_s11 = scalar_lea.vmem %s2270_s10, 2048 }
  0xc2   : > { %1230 = vrot.lane.b32.xlu1 %v1229_v54, %s2355_s13  ;;  %1310 = vrot.lane.b32.xlu0 %v2135_v58, %s2360_s27  ;;  %s188_s13 = sand.u32 1, %s2319_s16   ;;  %s2366_s27 = smov 20  }
  0xc6   : > { %1262 = vrot.lane.b32.xlu1 %v1261_v56, %s2356_s14  ;;  %1343 = vrot.lane.b32.xlu0 %v2135_v58, %s2361_s28  ;;  %s2578_s14 = sshll.u32 %s188_s13, 6 }
  0xc7   : > { %s2620_s20 = scalar_lea.vmem [#allocation4], %s2578_s14 }
  0xca   : > { %1295 = vrot.lane.b32.xlu1 %v1294_v59, %s2350_s8  ;;  %595 = vperm.xlu0 %2245, %v592_v63  }
  0xce   : > { %1327 = vrot.lane.b32.xlu1 %v1326_v61, %s2358_s22  ;;  %1434 = vperm.xlu0 %2245, %v584_v62   ;;  %s2364_s22 = smov 56  }
  0xd2   : > { %587 = vperm.xlu1 %2244, %v584_v62   ;;  %v502_v62 = vld [vmem:[%s3571_s1] sm:$0xf] }
  0xd6   : > { %1442 = vperm.xlu1 %2244, %v592_v63  }
 0x118   : > { %v378_v4 = vpop.permute.xlu0 %377 }
 0x119   : > { %v379_v7 = vrot.slane %v378_v4, 4 }
 0x11b   : > { %v381_v9 = vsel %vm380_vm14, %v378_v4, %v379_v7  ;;  %vm1346_vm14 = vcmask 605184  }
 0x11c   : > { %386 = vst.msk [vmem:[#allocation3] sm:$0xcc] %vm2511_vm15, %v381_v9  ;;  %v414_v11 = vpop.permute.xlu0 %413 }
 0x11d   : > { %v415_v13 = vrot.slane %v414_v11, 4 }
 0x11f   : > { %v417_v15 = vsel %vm416_vm1, %v414_v11, %v415_v13  ;;  %v1350_v11 = vld [vmem:[%s3571_s1] sm:$0xf] }
 0x120   : > { %419 = vst.msk [vmem:[#allocation3 + $0x8] sm:$0xcc] %vm2511_vm15, %v417_v15  ;;  %v447_v17 = vpop.permute.xlu0 %446 }
 0x121   : > { %v448_v19 = vrot.slane %v447_v17, 4 }
 0x123   : > { %v450_v21 = vsel %vm449_vm3, %v447_v17, %v448_v19  ;;  %v503_v28 = vld [vmem:[#allocation3] sm:$0xff] }
 0x124   : > { %v397_v0 = vpop.permute.xlu1 %396  ;;  %452 = vst.msk [vmem:[#allocation3 + $0x10] sm:$0xcc] %vm2511_vm15, %v450_v21  ;;  %v480_v23 = vpop.permute.xlu0 %479  ;;  %v2363_v21 = vmov 286326784  }
 0x125   : > { %v398_v1 = vrot.slane %v397_v0, 4  ;;  %v481_v25 = vrot.slane %v480_v23, 4 }
 0x127   : > { %v400_v2 = vsel %vm399_vm10, %v397_v0, %v398_v1  ;;  %v483_v27 = vsel %vm482_vm5, %v480_v23, %v481_v25  ;;  %vm1330_vm10 = vcmask 613376   ;;  %vm911_vm5 = vcmask 124930  }
 0x128   : > { %402 = vst.msk [vmem:[#allocation3 + $0x8] sm:$0x33] %vm2491_vm9, %v400_v2  ;;  %v430_v3 = vpop.permute.xlu1 %429  ;;  %v1214_v32 = vpop.permute.xlu0 %1213 }
 0x129   : > { %v431_v5 = vrot.slane %v430_v3, 4  ;;  %485 = vst.msk [vmem:[#allocation3 + $0x18] sm:$0xcc] %vm2511_vm15, %v483_v27  ;;  %v1215_v35 = vrot.slane %v1214_v32, 4 }
 0x12b   : > { %v433_v8 = vsel %vm432_vm13, %v430_v3, %v431_v5  ;;  %v1217_v37 = vsel %vm1216_vm8, %v1214_v32, %v1215_v35  ;;  %vm533_vm13 = vcmask 293888   ;;  %vm861_vm8 = vsmask.f32 7942 }
 0x12c   : > { %435 = vst.msk [vmem:[#allocation3 + $0x10] sm:$0x33] %vm2491_vm9, %v433_v8  ;;  %v463_v10 = vpop.permute.xlu1 %462  ;;  %v1247_v39 = vpop.permute.xlu0 %1246 }
 0x12d   : > { %v464_v12 = vrot.slane %v463_v10, 4  ;;  %v1248_v43 = vrot.slane %v1247_v39, 4 }
 0x12f   : > { %v466_v14 = vsel %vm465_vm0, %v463_v10, %v464_v12  ;;  %v504_v29 = vld [vmem:[#allocation3 + $0x8] sm:$0xff]  ;;  %v1249_v46 = vsel %vm416_vm1, %v1247_v39, %v1248_v43  ;;  %v606_v12 = vunpack.c.l.s4 %v2362_v42  ;;  %vm811_vm1 = vsmask.f32 1280 }
 0x130   : > { %468 = vst.msk [vmem:[#allocation3 + $0x18] sm:$0x33] %vm2491_vm9, %v466_v14  ;;  %v496_v16 = vpop.permute.xlu1 %495  ;;  %v2254_v30 = vld [vmem:[#allocation3 + $0x4] ss:$8 sps:$4 sm:$0xff]   ;;  %v2118_v33 = vcombine.low %v503_v28, %v504_v29  ;;  %v1279_v50 = vpop.permute.xlu0 %1278 }
 0x131   : > { %v497_v18 = vrot.slane %v496_v16, 4  ;;  %543 = vmatprep.subr.bf16.mxu0 %v2254_v30  ;;  %1219 = vst.msk [vmem:[#allocation3] sm:$0x33] %vm2491_vm9, %v1217_v37  ;;  %1251 = vst.msk [vmem:[#allocation3 + $0x8] sm:$0x33] %vm2491_vm9, %v1249_v46  ;;  %v1280_v54 = vrot.slane %v1279_v50, 4  ;;  %v607_v15 = vunpack.c.0.s8 %v606_v12 }
 0x132   : > { %544 = vmatpush1.bf16.msra.mxu0 %v2118_v33 }
 0x133   : > { %v499_v20 = vsel %vm498_vm2, %v496_v16, %v497_v18  ;;  %v505_v44 = vld [vmem:[#allocation3 + $0x10] sm:$0xff]  ;;  %v1282_v58 = vsel %vm1281_vm11, %v1279_v50, %v1280_v54  ;;  %vm760_vm2 = vsmask.f32 7938 }
 0x134   : > { %501 = vst.msk [vmem:[#allocation3 + $0x20] sm:$0x33] %vm2491_vm9, %v499_v20  ;;  %v1231_v22 = vpop.permute.xlu1 %1230  ;;  %1284 = vst.msk [vmem:[#allocation3 + $0x10] sm:$0x33] %vm2491_vm9, %v1282_v58  ;;  %v1311_v59 = vpop.permute.xlu0 %1310 }
 0x135   : > { %v1232_v24 = vrot.slane %v1231_v22, 4  ;;  %v1312_v60 = vrot.slane %v1311_v59, 4 }
 0x137   : > { %v1234_v26 = vsel %vm1233_vm4, %v1231_v22, %v1232_v24  ;;  %v506_v47 = vld [vmem:[#allocation3 + $0x18] sm:$0xff]  ;;  %v1314_v63 = vsel %vm1313_vm12, %v1311_v59, %v1312_v60  ;;  %v646_v22 = vunpack.c.l.s4 %v2363_v21  ;;  %vm1012_vm12 = vcmask 125955  }
 0x138   : > { %v1263_v31 = vpop.permute.xlu1 %1262  ;;  %1236 = vst.msk [vmem:[#allocation3] sm:$0xcc] %vm2511_vm15, %v1234_v26  ;;  %v2121_v51 = vcombine.high %v505_v44, %v506_v47  ;;  %v2120_v52 = vcombine.low %v505_v44, %v506_v47  ;;  %v1344_v2 = vpop.permute.xlu0 %1343  ;;  %v2564_v26 = vsub.s32 %v607_v15, %v2487_v41 }
 0x139   : > { %v1264_v34 = vrot.slane %v1263_v31, 4  ;;  %1316 = vst.msk [vmem:[#allocation3 + $0x18] sm:$0x33] %vm2491_vm9, %v1314_v63  ;;  %v1345_v3 = vrot.slane %v1344_v2, 4  ;;  %v647_v29 = vunpack.c.0.s8 %v646_v22 }
 0x13a   : > { %545 = vmatprep.subr.bf16.mxu0 %v2121_v51 }
 0x13b   : > { %v1266_v36 = vsel %vm1265_vm6, %v1263_v31, %v1264_v34  ;;  %v507_v48 = vld [vmem:[#allocation3 + $0x20] sm:$0x33]  ;;  %546 = vmatpush1.bf16.msra.mxu0 %v2120_v52  ;;  %v1347_v4 = vsel %vm1346_vm14, %v1344_v2, %v1345_v3  ;;  %v2569_v34 = vsub.s32 %v647_v29, %v2487_v41  ;;  %vm912_vm6 = vsmask.f32 2304 }
 0x13c   : > { %1268 = vst.msk [vmem:[#allocation3 + $0x8] sm:$0xcc] %vm2511_vm15, %v1266_v36  ;;  %v1296_v38 = vpop.permute.xlu1 %1295  ;;  %v2123_v55 = vcombine.high %v507_v48, %v507_v48  ;;  %v2122_v56 = vcombine.low %v507_v48, %v507_v48  ;;  %vm962_vm14 = vsmask.f32 7946 }
 0x13d   : > { %v1297_v40 = vrot.slane %v1296_v38, 4  ;;  %1349 = vst.msk [vmem:[#allocation3 + $0x20] sm:$0x33] %vm2491_vm9, %v1347_v4  ;;  %vm710_vm9 = vsmask.f32 256 }
 0x13e   : > { %2124 = vmatprep.subr.msk.bf16.mxu0 %vm363_vm7, %v2123_v55  ;;  %v538_v61 = vsel %vm363_vm7, %v2122_v56, 0 }
 0x13f   : > { %v1298_v45 = vsel %vm465_vm0, %v1296_v38, %v1297_v40  ;;  %548 = vmatpush1.bf16.msra.mxu0 %v538_v61  ;;  %vm810_vm0 = vcmask 123905  }
 0x140   : > { %1300 = vst.msk [vmem:[#allocation3 + $0x10] sm:$0xcc] %vm2511_vm15, %v1298_v45  ;;  %v1328_v49 = vpop.permute.xlu1 %1327  ;;  %vm2900_vm3 = vmand %vm810_vm0, %vm811_vm1 }
 0x141   : > { %v1329_v53 = vrot.slane %v1328_v49, 4  ;;  %vm2938_vm11 = vmand %vm810_vm0, %vm861_vm8  ;;  %vm1161_vm0 = vcmask 15360  }
 0x142   : > { %2125 = vmatmul.mubr.msk.bf16.vlgmr.msra.gmra.mrb[0].mxu0 %vm533_vm13, %v502_v62 }
 0x143   : > { %v1331_v57 = vsel %vm1330_vm10, %v1328_v49, %v1329_v53  ;;  %v2257_v0 = vld [vmem:[#allocation3 + $0x4] ss:$8 sps:$4 sm:$0xff]   ;;  %v2259_v1 = vld [vmem:[#allocation3] ss:$8 sps:$4 sm:$0xff]   ;;  %vm2931_vm10 = vmand %vm911_vm5, %vm912_vm6 }
 0x144   : > { %1333 = vst.msk [vmem:[#allocation3 + $0x18] sm:$0xcc] %vm2511_vm15, %v1331_v57  ;;  %1390 = vmatprep.subr.bf16.mxu1 %v2257_v0  ;;  %v1355_v7 = vld [vmem:[#allocation3 + $0x20] sm:$0x33] }
 0x145   : > { %1391 = vmatpush1.bf16.msra.mxu1 %v2259_v1  ;;  %v2145_v8 = vcombine.high %v1355_v7, %v1355_v7  ;;  %v2144_v9 = vcombine.low %v1355_v7, %v1355_v7 }
 0x147   : > { %v1385_v10 = vsel %vm363_vm7, %v2144_v9, 0 }
 0x149   : > { %v596_v18 = vpop.permute.xlu0 %595 }
 0x14b   : > { %v2260_v5 = vld [vmem:[#allocation3 + $0x14] ss:$8 sps:$4 sm:$0xff]   ;;  %v2262_v6 = vld [vmem:[#allocation3 + $0x10] ss:$8 sps:$4 sm:$0xff]  }
 0x14c   : > { %1392 = vmatprep.subr.bf16.mxu1 %v2260_v5 }
 0x14d   : > { %1393 = vmatpush1.bf16.msra.mxu1 %v2262_v6  ;;  %v1435_v61 = vpop.permute.xlu0 %1434 }
 0x14e   : > { %2146 = vmatprep.subr.msk.bf16.mxu1 %vm363_vm7, %v2145_v8  ;;  %vm709_vm7 = vcmask 122880  }
 0x14f   : > { %vm2615_vm15 = vmand %vm709_vm7, %vm710_vm9 }
 0x150   : > { %vm2910_vm4 = vmand %vm709_vm7, %vm760_vm2 }
 0x151   : > { %1395 = vmatpush1.bf16.msra.mxu1 %v1385_v10  ;;  %v588_v13 = vpop.permute.xlu1 %587  ;;  %vm2968_vm9 = vmand %vm911_vm5, %vm962_vm14 }
 0x154   : > { %2147 = vmatmul.mubr.msk.bf16.vlgmr.msra.gmra.mrb[0].mxu1 %vm533_vm13, %v1350_v11  ;;  %vm1013_vm13 = vsmask.f32 3328 }
 0x155   : > { %v1443_v4 = vpop.permute.xlu1 %1442  ;;  %vm2962_vm7 = vmand %vm1012_vm12, %vm1013_vm13 }
 0x215   : > { %v577_v14 = vpop.f32.mrb[0].mxu0 }
 0x216   : > { %v590_v16 = vmul.f32 %v588_v13, %v577_v14  ;;  %v579_v17 = vpop.f32.mrb[1].mxu0 }
 0x217   : > { %v591_v19 = vmul.f32 %v588_v13, %v579_v17  ;;  %v581_v20 = vpop.f32.mrb[2].mxu0 }
 0x218   : > { %v598_v23 = vadd.f32 %v596_v18, %v590_v16  ;;  %v582_v24 = vpop.f32.mrb[3].mxu0 }
 0x219   : > { %v599_v25 = vadd.f32 %v596_v18, %v591_v19  ;;  %v712_v18 = vld [vmem:[%s2620_s20] sm:$0x1]  ;;  %v715_v19 = vld [vmem:[%s2620_s20 + $0x8] sm:$0x1] }
 0x21a   : > { %v600_v27 = vmax.f32 %v598_v23, 0.0 }
 0x21b   : > { %v601_v28 = vmax.f32 %v599_v25, 0.0 }
 0x21c   : > { %v602_v30 = vpack.c.bf16 %v600_v27, %v600_v27 }
 0x21d   : > { %v2130_v31 = vpack.c.bf16 %v601_v28, %v600_v27 }
 0x21e   : > { %v611_v32 = vrot.slane %v602_v30, %v2564_v26 }
 0x21f   : > { %v1047_v33 = vrot.slane %v2130_v31, %v2564_v26 }
 0x220   : > { %v612_v35 = vcombine.high %v611_v32, %v611_v32  ;;  %v619_v36 = vrot.slane %v611_v32, %v2564_v26 }
 0x221   : > { %v1048_v37 = vcombine.high %v1047_v33, %v1047_v33  ;;  %v1055_v38 = vrot.slane %v1047_v33, %v2564_v26 }
 0x222   : > { %v626_v39 = vrot.slane %v612_v35, %v2564_v26  ;;  %v627_v40 = vcombine.high %v619_v36, %v619_v36  ;;  %v630_v43 = vunpack.i.h.s16 %v619_v36  ;;  %v2126_v44 = vpack.i.b16 %v619_v36, %v619_v36 }
 0x223   : > { %v2131_v45 = vpack.i.b16 %v1055_v38, %v1055_v38  ;;  %v1066_v46 = vunpack.i.h.s16 %v1055_v38  ;;  %v1062_v41 = vrot.slane %v1048_v37, %v2564_v26  ;;  %v1063_v47 = vcombine.high %v1055_v38, %v1055_v38 }
 0x224   : > { %v628_v48 = vcombine.high %v626_v39, %v626_v39  ;;  %v632_v49 = vunpack.i.h.s16 %v626_v39  ;;  %v634_v50 = vunpack.i.h.s16 %v627_v40  ;;  %v638_v51 = vpack.i.b16 %v630_v43, %v630_v43  ;;  %v724_v43 = vld [vmem:[%s2620_s20 + $0x20] sm:$0x1] }
 0x225   : > { %v2127_v52 = vpack.i.b16 %v626_v39, %v626_v39  ;;  %v2128_v53 = vpack.i.b16 %v627_v40, %v627_v40  ;;  %v2581_v54 = vrot.slane %v2126_v44, %v2569_v34  ;;  %v2584_v56 = vrot.slane %v2131_v45, %v2569_v34  ;;  %v718_v40 = vld [vmem:[%s2620_s20 + $0x10] sm:$0x1] }
 0x226   : > { %v636_v57 = vunpack.i.h.s16 %v628_v48  ;;  %v640_v58 = vpack.i.b16 %v632_v49, %v632_v49  ;;  %v642_v59 = vpack.i.b16 %v634_v50, %v634_v50  ;;  %v2129_v60 = vpack.i.b16 %v628_v48, %v628_v48  ;;  %v721_v48 = vld [vmem:[%s2620_s20 + $0x18] sm:$0x1]  ;;  %v727_v49 = vld [vmem:[%s2620_s20 + $0x28] sm:$0x1] }
 0x227   : > { %v1424_v55 = vpop.f32.mrb[0].mxu1  ;;  %v2587_v63 = vrot.slane %v638_v51, %v2569_v34  ;;  %v2590_v0 = vrot.slane %v2127_v52, %v2569_v34  ;;  %v2593_v1 = vrot.slane %v2128_v53, %v2569_v34  ;;  %786 = vrot.lane.b32.xlu0 %v2581_v54, %s2350_s8  ;;  %736 = vrot.lane.b32.xlu1 %v2581_v54, %s2351_s9  ;;  %v1068_v15 = vunpack.i.h.s16 %v1062_v41 }
 0x228   : > { %v1426_v62 = vpop.f32.mrb[1].mxu1  ;;  %v1437_v2 = vmul.f32 %v1435_v61, %v1424_v55  ;;  %v644_v5 = vpack.i.b16 %v636_v57, %v636_v57  ;;  %v2598_v6 = vrot.slane %v640_v58, %v2569_v34  ;;  %v2601_v7 = vrot.slane %v642_v59, %v2569_v34 }
 0x229   : > { %v1428_v3 = vpop.f32.mrb[2].mxu1  ;;  %v2604_v8 = vrot.slane %v2129_v60, %v2569_v34  ;;  %v1438_v11 = vmul.f32 %v1435_v61, %v1426_v62  ;;  %v2608_v42 = vpack.i.b16 %v1066_v46, %v1066_v46  ;;  %v2132_v12 = vpack.i.b16 %v1062_v41, %v1062_v41 }
 0x22a   : > { %v1429_v9 = vpop.f32.mrb[3].mxu1  ;;  %v1445_v10 = vadd.f32 %v1443_v4, %v1437_v2  ;;  %v2611_v13 = vrot.slane %v644_v5, %v2569_v34  ;;  %v2133_v14 = vpack.i.b16 %v1063_v47, %v1063_v47  ;;  %v1070_v16 = vunpack.i.h.s16 %v1063_v47 }
 0x22b   : > { %v1446_v21 = vadd.f32 %v1443_v4, %v1438_v11  ;;  %837 = vrot.lane.b32.xlu0 %v2581_v54, %s2361_s28  ;;  %v1094_v22 = vrot.slane %v2608_v42, %v2569_v34  ;;  %v2629_v23 = vrot.slane %v2132_v12, %v2569_v34  ;;  %738 = vrot.lane.b32.xlu1 %v2587_v63, %s2351_s9 }
 0x22c   : > { %v1447_v20 = vmax.f32 %v1445_v10, 0.0  ;;  %v2634_v24 = vrot.slane %v2133_v14, %v2569_v34  ;;  %v2636_v25 = vpack.i.b16 %v1068_v15, %v1068_v15  ;;  %v2638_v27 = vpack.i.b16 %v1070_v16, %v1070_v16 }
 0x22d   : > { %v1064_v28 = vcombine.high %v1062_v41, %v1062_v41  ;;  %v1448_v30 = vmax.f32 %v1446_v21, 0.0  ;;  %v713_v31 = vsel %vm2615_vm15, %v2581_v54, %v712_v18  ;;  %v716_v32 = vsel %vm2615_vm15, %v2587_v63, %v715_v19 }
 0x22e   : > { %v1449_v29 = vpack.c.bf16 %v1447_v20, %v1447_v20  ;;  %v1108_v33 = vrot.slane %v2636_v25, %v2569_v34  ;;  %v1122_v35 = vrot.slane %v2638_v27, %v2569_v34  ;;  %714 = vst [vmem:[%s2620_s20] sm:$0x1] %v713_v31  ;;  %717 = vst [vmem:[%s2620_s20 + $0x8] sm:$0x1] %v716_v32  ;;  %v733_v32 = vld [vmem:[%s2620_s20 + $0x38] sm:$0x1] }
 0x22f   : > { %v2134_v36 = vpack.i.b16 %v1064_v28, %v1064_v28  ;;  %v1072_v37 = vunpack.i.h.s16 %v1064_v28  ;;  %v2152_v39 = vpack.c.bf16 %v1448_v30, %v1447_v20  ;;  %887 = vrot.lane.b32.xlu0 %v2581_v54, %s2364_s22  ;;  %788 = vrot.lane.b32.xlu1 %v2587_v63, %s2350_s8  ;;  %v719_v51 = vsel %vm2615_vm15, %v2590_v0, %v718_v40  ;;  %v730_v28 = vld [vmem:[%s2620_s20 + $0x30] sm:$0x1] }
 0x230   : > { %v1458_v38 = vrot.slane %v1449_v29, %v2564_v26  ;;  %v725_v52 = vsel %vm2615_vm15, %v2593_v1, %v724_v43  ;;  %720 = vst [vmem:[%s2620_s20 + $0x10] sm:$0x1] %v719_v51  ;;  %v722_v61 = vsel %vm2615_vm15, %v2598_v6, %v721_v48  ;;  %v728_v62 = vsel %vm2615_vm15, %v2601_v7, %v727_v49 }
 0x231   : > { %v2660_v44 = vrot.slane %v2134_v36, %v2569_v34  ;;  %v2662_v45 = vpack.i.b16 %v1072_v37, %v1072_v37  ;;  %v1876_v47 = vrot.slane %v2152_v39, %v2564_v26  ;;  %726 = vst [vmem:[%s2620_s20 + $0x20] sm:$0x1] %v725_v52  ;;  %723 = vst [vmem:[%s2620_s20 + $0x18] sm:$0x1] %v722_v61  ;;  %v1556_v39 = vld [vmem:[%s2620_s20 + $0x4] sm:$0x1] }
 0x232   : > { %v1459_v46 = vcombine.high %v1458_v38, %v1458_v38  ;;  %v1466_v41 = vrot.slane %v1458_v38, %v2564_v26  ;;  %729 = vst [vmem:[%s2620_s20 + $0x28] sm:$0x1] %v728_v62  ;;  %v1562_v52 = vld [vmem:[%s2620_s20 + $0x14] sm:$0x1] }
 0x233   : > { %v1136_v50 = vrot.slane %v2662_v45, %v2569_v34  ;;  %938 = vrot.lane.b32.xlu0 %v2581_v54, %s2365_s23  ;;  %v1877_v59 = vcombine.high %v1876_v47, %v1876_v47  ;;  %v1884_v60 = vrot.slane %v1876_v47, %v2564_v26  ;;  %839 = vrot.lane.b32.xlu1 %v2587_v63, %s2361_s28  ;;  %v1559_v47 = vld [vmem:[%s2620_s20 + $0xc] sm:$0x1] }
 0x234   : > { %v1473_v53 = vrot.slane %v1459_v46, %v2564_v26  ;;  %v1474_v55 = vcombine.high %v1466_v41, %v1466_v41  ;;  %v1477_v57 = vunpack.i.h.s16 %v1466_v41  ;;  %v2148_v58 = vpack.i.b16 %v1466_v41, %v1466_v41 }
 0x235   : > { %v1891_v12 = vrot.slane %v1877_v59, %v2564_v26  ;;  %v2153_v26 = vpack.i.b16 %v1884_v60, %v1884_v60  ;;  %v1895_v37 = vunpack.i.h.s16 %v1884_v60  ;;  %v1892_v43 = vcombine.high %v1884_v60, %v1884_v60  ;;  %v1568_v59 = vld [vmem:[%s2620_s20 + $0x24] sm:$0x1]  ;;  %v1565_v60 = vld [vmem:[%s2620_s20 + $0x1c] sm:$0x1]  ;;  %v762_v42 = vld [vmem:[%s2620_s20] sm:$0x1] }
 0x236   : > { %v1475_v2 = vcombine.high %v1473_v53, %v1473_v53  ;;  %v1479_v3 = vunpack.i.h.s16 %v1473_v53  ;;  %v1481_v4 = vunpack.i.h.s16 %v1474_v55  ;;  %v1485_v5 = vpack.i.b16 %v1477_v57, %v1477_v57 }
 0x237   : > { %v2149_v9 = vpack.i.b16 %v1473_v53, %v1473_v53  ;;  %v2150_v10 = vpack.i.b16 %v1474_v55, %v1474_v55  ;;  %v2693_v11 = vrot.slane %v2148_v58, %v2569_v34  ;;  %988 = vrot.lane.b32.xlu0 %v2581_v54, %s2366_s27  ;;  %889 = vrot.lane.b32.xlu1 %v2587_v63, %s2364_s22  ;;  %v1897_v46 = vunpack.i.h.s16 %v1891_v12 }
 0x238   : > { %v1483_v14 = vunpack.i.h.s16 %v1475_v2  ;;  %v1487_v15 = vpack.i.b16 %v1479_v3, %v1479_v3  ;;  %v1489_v16 = vpack.i.b16 %v1481_v4, %v1481_v4  ;;  %v2151_v18 = vpack.i.b16 %v1475_v2, %v1475_v2  ;;  %v1571_v4 = vld [vmem:[%s2620_s20 + $0x2c] sm:$0x1] }
 0x239   : > { %v2699_v19 = vrot.slane %v1485_v5, %v2569_v34  ;;  %v2702_v20 = vrot.slane %v2149_v9, %v2569_v34  ;;  %v2705_v21 = vrot.slane %v2150_v10, %v2569_v34  ;;  %v2721_v36 = vrot.slane %v2153_v26, %v2569_v34  ;;  %v1574_v5 = vld [vmem:[%s2620_s20 + $0x34] sm:$0x1]  ;;  %v1577_v9 = vld [vmem:[%s2620_s20 + $0x3c] sm:$0x1] }
 0x23a   : > { %v1491_v29 = vpack.i.b16 %v1483_v14, %v1483_v14  ;;  %v2711_v30 = vrot.slane %v1487_v15, %v2569_v34  ;;  %v2714_v54 = vrot.slane %v1489_v16, %v2569_v34  ;;  %v2717_v31 = vrot.slane %v2151_v18, %v2569_v34 }
 0x23b   : > { %v2154_v38 = vpack.i.b16 %v1891_v12, %v1891_v12  ;;  %1137 = vrot.lane.b32.xlu0 %v2584_v56, %s2367_s29  ;;  %v731_v41 = vsel %vm2615_vm15, %v2604_v8, %v730_v28  ;;  %940 = vrot.lane.b32.xlu1 %v2587_v63, %s2365_s23  ;;  %v2735_v48 = vpack.i.b16 %v1895_v37, %v1895_v37  ;;  %v1899_v57 = vunpack.i.h.s16 %v1892_v43 }
 0x23c   : > { %v2725_v40 = vrot.slane %v1491_v29, %v2569_v34  ;;  %732 = vst [vmem:[%s2620_s20 + $0x30] sm:$0x1] %v731_v41  ;;  %v734_v56 = vsel %vm2615_vm15, %v2611_v13, %v733_v32  ;;  %v1893_v51 = vcombine.high %v1891_v12, %v1891_v12  ;;  %v2155_v53 = vpack.i.b16 %v1892_v43, %v1892_v43 }
 0x23d   : > { %v2738_v49 = vrot.slane %v2154_v38, %v2569_v34  ;;  %v2745_v55 = vpack.i.b16 %v1897_v46, %v1897_v46  ;;  %735 = vst [vmem:[%s2620_s20 + $0x38] sm:$0x1] %v734_v56  ;;  %v1557_v58 = vsel %vm2615_vm15, %v2693_v11, %v1556_v39  ;;  %v1923_v61 = vrot.slane %v2735_v48, %v2569_v34 }
 0x23e   : > { %v2156_v62 = vpack.i.b16 %v1893_v51, %v1893_v51  ;;  %v1901_v2 = vunpack.i.h.s16 %v1893_v51  ;;  %1558 = vst [vmem:[%s2620_s20 + $0x4] sm:$0x1] %v1557_v58  ;;  %v1560_v3 = vsel %vm2615_vm15, %v2699_v19, %v1559_v47  ;;  %v2765_v10 = vrot.slane %v2155_v53, %v2569_v34 }
 0x23f   : > { %740 = vrot.lane.b32.xlu0 %v2590_v0, %s2351_s9  ;;  %v1937_v12 = vrot.slane %v2745_v55, %v2569_v34  ;;  %v2769_v14 = vpack.i.b16 %v1899_v57, %v1899_v57  ;;  %1561 = vst [vmem:[%s2620_s20 + $0xc] sm:$0x1] %v1560_v3  ;;  %v1563_v15 = vsel %vm2615_vm15, %v2702_v20, %v1562_v52  ;;  %v1015_v52 = vld [vmem:[%s2620_s20] sm:$0x8]  ;;  %v917_v57 = vld [vmem:[%s2620_s20 + $0x8] sm:$0x4] }
 0x240   : > { %990 = vrot.lane.b32.xlu1 %v2587_v63, %s2366_s27  ;;  %v2778_v16 = vrot.slane %v2156_v62, %v2569_v34  ;;  %v2780_v18 = vpack.i.b16 %v1901_v2, %v1901_v2  ;;  %1564 = vst [vmem:[%s2620_s20 + $0x14] sm:$0x1] %v1563_v15  ;;  %v1569_v26 = vsel %vm2615_vm15, %v2705_v21, %v1568_v59  ;;  %v831_v55 = vld [vmem:[%s2620_s20 + $0x30] sm:$0x2] }
 0x241   : > { %v1566_v28 = vsel %vm2615_vm15, %v2711_v30, %v1565_v60  ;;  %v1951_v29 = vrot.slane %v2769_v14, %v2569_v34  ;;  %1570 = vst [vmem:[%s2620_s20 + $0x24] sm:$0x1] %v1569_v26  ;;  %v1572_v63 = vsel %vm2615_vm15, %v2714_v54, %v1571_v4  ;;  %v1575_v32 = vsel %vm2615_vm15, %v2717_v31, %v1574_v5  ;;  %v1018_v26 = vld [vmem:[%s2620_s20 + $0x8] sm:$0x8] }
 0x242   : > { %1567 = vst [vmem:[%s2620_s20 + $0x1c] sm:$0x1] %v1566_v28  ;;  %v1578_v37 = vsel %vm2615_vm15, %v2725_v40, %v1577_v9  ;;  %v1965_v38 = vrot.slane %v2780_v18, %v2569_v34  ;;  %1573 = vst [vmem:[%s2620_s20 + $0x2c] sm:$0x1] %v1572_v63  ;;  %vm1178_vm15 = vsmask.f32 7950 }
 0x243   : > { %1576 = vst [vmem:[%s2620_s20 + $0x34] sm:$0x1] %v1575_v32  ;;  %1579 = vst [vmem:[%s2620_s20 + $0x3c] sm:$0x1] %v1578_v37  ;;  %744 = vrot.lane.b32.xlu0 %v2593_v1, %s2351_s9  ;;  %v768_v63 = vld [vmem:[%s2620_s20 + $0x10] sm:$0x1] }
 0x244   : > { %1139 = vrot.lane.b32.xlu1 %v1094_v22, %s2367_s29  ;;  %vm2996_vm1 = vmand %vm1012_vm12, %vm1178_vm15  ;;  %v1652_v18 = vld [vmem:[%s2620_s20 + $0x4] sm:$0x2] }
 0x247   : > { %790 = vrot.lane.b32.xlu0 %v2590_v0, %s2350_s8 }
 0x248   : > { %742 = vrot.lane.b32.xlu1 %v2598_v6, %s2351_s9 }
 0x24b   : > { %794 = vrot.lane.b32.xlu0 %v2593_v1, %s2350_s8 }
 0x24c   : > { %746 = vrot.lane.b32.xlu1 %v2601_v7, %s2351_s9 }
 0x24f   : > { %841 = vrot.lane.b32.xlu0 %v2590_v0, %s2361_s28 }
 0x250   : > { %792 = vrot.lane.b32.xlu1 %v2598_v6, %s2350_s8 }
 0x253   : > { %845 = vrot.lane.b32.xlu0 %v2593_v1, %s2361_s28 }
 0x254   : > { %796 = vrot.lane.b32.xlu1 %v2601_v7, %s2350_s8 }
 0x257   : > { %891 = vrot.lane.b32.xlu0 %v2590_v0, %s2364_s22 }
 0x258   : > { %843 = vrot.lane.b32.xlu1 %v2598_v6, %s2361_s28 }
 0x25b   : > { %895 = vrot.lane.b32.xlu0 %v2593_v1, %s2364_s22 }
 0x25c   : > { %847 = vrot.lane.b32.xlu1 %v2601_v7, %s2361_s28 }
 0x25f   : > { %942 = vrot.lane.b32.xlu0 %v2590_v0, %s2365_s23 }
 0x260   : > { %893 = vrot.lane.b32.xlu1 %v2598_v6, %s2364_s22 }
 0x263   : > { %946 = vrot.lane.b32.xlu0 %v2593_v1, %s2365_s23 }
 0x264   : > { %897 = vrot.lane.b32.xlu1 %v2601_v7, %s2364_s22 }
 0x267   : > { %992 = vrot.lane.b32.xlu0 %v2590_v0, %s2366_s27  ;;  %v1865_v0 = vld [vmem:[%s2620_s20 + $0x3c] sm:$0x8] }
 0x268   : > { %944 = vrot.lane.b32.xlu1 %v2598_v6, %s2365_s23 }
 0x26b   : > { %996 = vrot.lane.b32.xlu0 %v2593_v1, %s2366_s27  ;;  %v813_v1 = vld [vmem:[%s2620_s20] sm:$0x2] }
 0x26c   : > { %948 = vrot.lane.b32.xlu1 %v2601_v7, %s2365_s23 }
 0x26f   : > { %1141 = vrot.lane.b32.xlu0 %v2629_v23, %s2367_s29 }
 0x270   : > { %994 = vrot.lane.b32.xlu1 %v2598_v6, %s2366_s27  ;;  %v1769_v6 = vld [vmem:[%s2620_s20 + $0x3c] sm:$0x4] }
 0x273   : > { %1145 = vrot.lane.b32.xlu0 %v2634_v24, %s2367_s29  ;;  %v765_v24 = vld [vmem:[%s2620_s20 + $0x8] sm:$0x1] }
 0x274   : > { %998 = vrot.lane.b32.xlu1 %v2601_v7, %s2366_s27 }
 0x277   : > { %748 = vrot.lane.b32.xlu0 %v2604_v8, %s2351_s9 }
 0x278   : > { %1143 = vrot.lane.b32.xlu1 %v1108_v33, %s2367_s29  ;;  %v914_v33 = vld [vmem:[%s2620_s20] sm:$0x4] }
 0x27b   : > { %798 = vrot.lane.b32.xlu0 %v2604_v8, %s2350_s8 }
 0x27c   : > { %1147 = vrot.lane.b32.xlu1 %v1122_v35, %s2367_s29 }
 0x27f   : > { %849 = vrot.lane.b32.xlu0 %v2604_v8, %s2361_s28 }
 0x280   : > { %750 = vrot.lane.b32.xlu1 %v2611_v13, %s2351_s9 }
 0x283   : > { %899 = vrot.lane.b32.xlu0 %v2604_v8, %s2364_s22 }
 0x284   : > { %800 = vrot.lane.b32.xlu1 %v2611_v13, %s2350_s8 }
 0x287   : > { %950 = vrot.lane.b32.xlu0 %v2604_v8, %s2365_s23 }
 0x288   : > { %851 = vrot.lane.b32.xlu1 %v2611_v13, %s2361_s28 }
 0x28b   : > { %1000 = vrot.lane.b32.xlu0 %v2604_v8, %s2366_s27 }
 0x28c   : > { %901 = vrot.lane.b32.xlu1 %v2611_v13, %s2364_s22 }
 0x28f   : > { %1149 = vrot.lane.b32.xlu0 %v2660_v44, %s2367_s29  ;;  %v816_v44 = vld [vmem:[%s2620_s20 + $0x8] sm:$0x2] }
 0x290   : > { %952 = vrot.lane.b32.xlu1 %v2611_v13, %s2365_s23 }
 0x293   : > { %1580 = vrot.lane.b32.xlu0 %v2693_v11, %s2351_s9 }
 0x294   : > { %1002 = vrot.lane.b32.xlu1 %v2611_v13, %s2366_s27 }
 0x297   : > { %1628 = vrot.lane.b32.xlu0 %v2693_v11, %s2350_s8 }
 0x298   : > { %1151 = vrot.lane.b32.xlu1 %v1136_v50, %s2367_s29 }
 0x299   : > { %v787_v7 = vpop.permute.xlu0 %786  ;;  %v737_v8 = vpop.permute.xlu1 %736 }
 0x29a   : > { %v814_v13 = vsel %vm2900_vm3, %v787_v7, %v813_v1  ;;  %v763_v17 = vsel %vm2910_vm4, %v737_v8, %v762_v42 }
 0x29b   : > { %815 = vst [vmem:[%s2620_s20] sm:$0x2] %v814_v13  ;;  %1676 = vrot.lane.b32.xlu0 %v2693_v11, %s2361_s28  ;;  %764 = vst [vmem:[%s2620_s20] sm:$0x1] %v763_v17 }
 0x29c   : > { %1582 = vrot.lane.b32.xlu1 %v2699_v19, %s2351_s9 }
 0x29d   : > { %v838_v22 = vpop.permute.xlu0 %837  ;;  %v739_v23 = vpop.permute.xlu1 %738 }
 0x29e   : > { %v766_v25 = vsel %vm2910_vm4, %v739_v23, %v765_v24 }
 0x29f   : > { %1724 = vrot.lane.b32.xlu0 %v2693_v11, %s2364_s22  ;;  %767 = vst [vmem:[%s2620_s20 + $0x8] sm:$0x1] %v766_v25 }
 0x2a0   : > { %1630 = vrot.lane.b32.xlu1 %v2699_v19, %s2350_s8 }
 0x2a1   : > { %v888_v45 = vpop.permute.xlu0 %887  ;;  %v789_v39 = vpop.permute.xlu1 %788 }
 0x2a2   : > { %v863_v50 = vld [vmem:[%s2620_s20] sm:$0x2]  ;;  %v915_v43 = vsel %vm2931_vm10, %v888_v45, %v914_v33  ;;  %v817_v41 = vsel %vm2900_vm3, %v789_v39, %v816_v44  ;;  %v819_v33 = vld [vmem:[%s2620_s20 + $0x10] sm:$0x2]  ;;  %v771_v44 = vld [vmem:[%s2620_s20 + $0x18] sm:$0x1] }
 0x2a3   : > { %v864_v46 = vsel %vm2938_vm11, %v838_v22, %v863_v50  ;;  %916 = vst [vmem:[%s2620_s20] sm:$0x4] %v915_v43  ;;  %1820 = vrot.lane.b32.xlu0 %v2693_v11, %s2366_s27  ;;  %818 = vst [vmem:[%s2620_s20 + $0x8] sm:$0x2] %v817_v41  ;;  %v774_v22 = vld [vmem:[%s2620_s20 + $0x20] sm:$0x1] }
 0x2a4   : > { %865 = vst [vmem:[%s2620_s20] sm:$0x2] %v864_v46  ;;  %1678 = vrot.lane.b32.xlu1 %v2699_v19, %s2361_s28  ;;  %v825_v46 = vld [vmem:[%s2620_s20 + $0x20] sm:$0x2] }
 0x2a5   : > { %v939_v47 = vpop.permute.xlu0 %938  ;;  %v840_v56 = vpop.permute.xlu1 %839 }
 0x2a7   : > { %1772 = vrot.lane.b32.xlu0 %v2693_v11, %s2365_s23 }
 0x2a8   : > { %1726 = vrot.lane.b32.xlu1 %v2699_v19, %s2364_s22 }
 0x2a9   : > { %v989_v58 = vpop.permute.xlu0 %988  ;;  %v890_v59 = vpop.permute.xlu1 %889 }
 0x2aa   : > { %v964_v11 = vld [vmem:[%s2620_s20] sm:$0x4]  ;;  %v1016_v60 = vsel %vm2962_vm7, %v989_v58, %v1015_v52  ;;  %v866_v62 = vld [vmem:[%s2620_s20 + $0x8] sm:$0x2]  ;;  %v918_v3 = vsel %vm2931_vm10, %v890_v59, %v917_v57  ;;  %v777_v52 = vld [vmem:[%s2620_s20 + $0x28] sm:$0x1] }
 0x2ab   : > { %v965_v2 = vsel %vm2968_vm9, %v939_v47, %v964_v11  ;;  %1017 = vst [vmem:[%s2620_s20] sm:$0x8] %v1016_v60  ;;  %1966 = vrot.lane.b32.xlu0 %v2721_v36, %s2367_s29  ;;  %v867_v4 = vsel %vm2938_vm11, %v840_v56, %v866_v62  ;;  %919 = vst [vmem:[%s2620_s20 + $0x8] sm:$0x4] %v918_v3  ;;  %v822_v11 = vld [vmem:[%s2620_s20 + $0x18] sm:$0x2] }
 0x2ac   : > { %966 = vst [vmem:[%s2620_s20] sm:$0x4] %v965_v2  ;;  %1822 = vrot.lane.b32.xlu1 %v2699_v19, %s2366_s27  ;;  %868 = vst [vmem:[%s2620_s20 + $0x8] sm:$0x2] %v867_v4  ;;  %v828_v4 = vld [vmem:[%s2620_s20 + $0x28] sm:$0x2] }
 0x2ad   : > { %v1138_v5 = vpop.permute.xlu0 %1137  ;;  %v941_v9 = vpop.permute.xlu1 %940 }
 0x2ae   : > { %v1153_v15 = vrot.slane %v1138_v5, 4 }
 0x2af   : > { %1584 = vrot.lane.b32.xlu0 %v2702_v20, %s2351_s9 }
 0x2b0   : > { %1774 = vrot.lane.b32.xlu1 %v2699_v19, %s2365_s23  ;;  %v1162_v32 = vsel %vm1161_vm0, %v1138_v5, %v1153_v15 }
 0x2b1   : > { %v741_v28 = vpop.permute.xlu0 %740 }
 0x2b2   : > { %v1180_v37 = vld [vmem:[%s2620_s20] sm:$0x8]  ;;  %v991_v1 = vpop.permute.xlu1 %990  ;;  %v769_v7 = vsel %vm2910_vm4, %v741_v28, %v768_v63  ;;  %v967_v8 = vld [vmem:[%s2620_s20 + $0x8] sm:$0x4]  ;;  %v920_v63 = vld [vmem:[%s2620_s20 + $0x10] sm:$0x4] }
 0x2b3   : > { %v1181_v42 = vsel %vm2996_vm1, %v1162_v32, %v1180_v37  ;;  %v1019_v19 = vsel %vm2962_vm7, %v991_v1, %v1018_v26  ;;  %770 = vst [vmem:[%s2620_s20 + $0x10] sm:$0x1] %v769_v7  ;;  %1588 = vrot.lane.b32.xlu0 %v2705_v21, %s2351_s9  ;;  %v968_v13 = vsel %vm2968_vm9, %v941_v9, %v967_v8  ;;  %v926_v8 = vld [vmem:[%s2620_s20 + $0x20] sm:$0x4] }
 0x2b4   : > { %1182 = vst [vmem:[%s2620_s20] sm:$0x8] %v1181_v42  ;;  %1020 = vst [vmem:[%s2620_s20 + $0x8] sm:$0x8] %v1019_v19  ;;  %1968 = vrot.lane.b32.xlu1 %v1923_v61, %s2367_s29 }
 0x2b5   : > { %969 = vst [vmem:[%s2620_s20 + $0x8] sm:$0x4] %v968_v13  ;;  %v745_v17 = vpop.permute.xlu0 %744 }
 0x2b6   : > { %v1140_v23 = vpop.permute.xlu1 %1139  ;;  %v775_v24 = vsel %vm2910_vm4, %v745_v17, %v774_v22 }
 0x2b7   : > { %v1154_v25 = vrot.slane %v1140_v23, 4  ;;  %776 = vst [vmem:[%s2620_s20 + $0x20] sm:$0x1] %v775_v24  ;;  %1632 = vrot.lane.b32.xlu0 %v2702_v20, %s2350_s8  ;;  %v923_v24 = vld [vmem:[%s2620_s20 + $0x18] sm:$0x4] }
 0x2b8   : > { %1586 = vrot.lane.b32.xlu1 %v2711_v30, %s2351_s9 }
 0x2b9   : > { %v791_v48 = vpop.permute.xlu0 %790  ;;  %v1163_v50 = vsel %vm1161_vm0, %v1140_v23, %v1154_v25 }
 0x2ba   : > { %v743_v61 = vpop.permute.xlu1 %742  ;;  %v820_v45 = vsel %vm2900_vm3, %v791_v48, %v819_v33 }
 0x2bb   : > { %v1183_v39 = vld [vmem:[%s2620_s20 + $0x8] sm:$0x8]  ;;  %v772_v43 = vsel %vm2910_vm4, %v743_v61, %v771_v44  ;;  %821 = vst [vmem:[%s2620_s20 + $0x10] sm:$0x2] %v820_v45  ;;  %1636 = vrot.lane.b32.xlu0 %v2705_v21, %s2350_s8  ;;  %v929_v45 = vld [vmem:[%s2620_s20 + $0x28] sm:$0x4] }
 0x2bc   : > { %v1184_v41 = vsel %vm2996_vm1, %v1163_v50, %v1183_v39  ;;  %773 = vst [vmem:[%s2620_s20 + $0x18] sm:$0x1] %v772_v43  ;;  %1590 = vrot.lane.b32.xlu1 %v2714_v54, %s2351_s9 }
 0x2bd   : > { %1185 = vst [vmem:[%s2620_s20 + $0x8] sm:$0x8] %v1184_v41  ;;  %v795_v47 = vpop.permute.xlu0 %794 }
 0x2be   : > { %v747_v56 = vpop.permute.xlu1 %746  ;;  %v826_v57 = vsel %vm2900_vm3, %v795_v47, %v825_v46  ;;  %v1021_v47 = vld [vmem:[%s2620_s20 + $0x10] sm:$0x8] }
 0x2bf   : > { %v778_v58 = vsel %vm2910_vm4, %v747_v56, %v777_v52  ;;  %827 = vst [vmem:[%s2620_s20 + $0x20] sm:$0x2] %v826_v57  ;;  %1680 = vrot.lane.b32.xlu0 %v2702_v20, %s2361_s28 }
 0x2c0   : > { %779 = vst [vmem:[%s2620_s20 + $0x28] sm:$0x1] %v778_v58  ;;  %1634 = vrot.lane.b32.xlu1 %v2711_v30, %s2350_s8 }
 0x2c1   : > { %v842_v59 = vpop.permute.xlu0 %841 }
 0x2c2   : > { %v793_v60 = vpop.permute.xlu1 %792  ;;  %v869_v62 = vld [vmem:[%s2620_s20 + $0x10] sm:$0x2] }
 0x2c3   : > { %v823_v2 = vsel %vm2900_vm3, %v793_v60, %v822_v11  ;;  %v870_v3 = vsel %vm2938_vm11, %v842_v59, %v869_v62  ;;  %1684 = vrot.lane.b32.xlu0 %v2705_v21, %s2361_s28 }
 0x2c4   : > { %824 = vst [vmem:[%s2620_s20 + $0x18] sm:$0x2] %v823_v2  ;;  %871 = vst [vmem:[%s2620_s20 + $0x10] sm:$0x2] %v870_v3  ;;  %1638 = vrot.lane.b32.xlu1 %v2714_v54, %s2350_s8  ;;  %v1024_v3 = vld [vmem:[%s2620_s20 + $0x18] sm:$0x8] }
 0x2c5   : > { %v846_v5 = vpop.permute.xlu0 %845 }
 0x2c6   : > { %v797_v9 = vpop.permute.xlu1 %796  ;;  %v875_v15 = vld [vmem:[%s2620_s20 + $0x20] sm:$0x2] }
 0x2c7   : > { %v829_v26 = vsel %vm2900_vm3, %v797_v9, %v828_v4  ;;  %v876_v28 = vsel %vm2938_vm11, %v846_v5, %v875_v15  ;;  %1728 = vrot.lane.b32.xlu0 %v2702_v20, %s2364_s22 }
 0x2c8   : > { %830 = vst [vmem:[%s2620_s20 + $0x28] sm:$0x2] %v829_v26  ;;  %877 = vst [vmem:[%s2620_s20 + $0x20] sm:$0x2] %v876_v28  ;;  %1682 = vrot.lane.b32.xlu1 %v2711_v30, %s2361_s28 }
 0x2c9   : > { %v892_v32 = vpop.permute.xlu0 %891 }
 0x2ca   : > { %v844_v37 = vpop.permute.xlu1 %843  ;;  %v921_v1 = vsel %vm2931_vm10, %v892_v32, %v920_v63 }
 0x2cb   : > { %v872_v7 = vld [vmem:[%s2620_s20 + $0x18] sm:$0x2]  ;;  %922 = vst [vmem:[%s2620_s20 + $0x10] sm:$0x4] %v921_v1  ;;  %1732 = vrot.lane.b32.xlu0 %v2705_v21, %s2364_s22 }
 0x2cc   : > { %v873_v42 = vsel %vm2938_vm11, %v844_v37, %v872_v7  ;;  %1686 = vrot.lane.b32.xlu1 %v2714_v54, %s2361_s28 }
 0x2cd   : > { %874 = vst [vmem:[%s2620_s20 + $0x18] sm:$0x2] %v873_v42  ;;  %v896_v19 = vpop.permute.xlu0 %895  ;;  %v780_v42 = vld [vmem:[%s2620_s20 + $0x30] sm:$0x1] }
 0x2ce   : > { %v848_v13 = vpop.permute.xlu1 %847  ;;  %v927_v17 = vsel %vm2931_vm10, %v896_v19, %v926_v8 }
 0x2cf   : > { %v878_v22 = vld [vmem:[%s2620_s20 + $0x28] sm:$0x2]  ;;  %928 = vst [vmem:[%s2620_s20 + $0x20] sm:$0x4] %v927_v17  ;;  %1824 = vrot.lane.b32.xlu0 %v2702_v20, %s2366_s27 }
 0x2d0   : > { %v879_v23 = vsel %vm2938_vm11, %v848_v13, %v878_v22  ;;  %1730 = vrot.lane.b32.xlu1 %v2711_v30, %s2364_s22 }
 0x2d1   : > { %880 = vst [vmem:[%s2620_s20 + $0x28] sm:$0x2] %v879_v23  ;;  %v943_v25 = vpop.permute.xlu0 %942 }
 0x2d2   : > { %v894_v33 = vpop.permute.xlu1 %893  ;;  %v970_v48 = vld [vmem:[%s2620_s20 + $0x10] sm:$0x4] }
 0x2d3   : > { %v924_v61 = vsel %vm2931_vm10, %v894_v33, %v923_v24  ;;  %v971_v44 = vsel %vm2968_vm9, %v943_v25, %v970_v48  ;;  %1828 = vrot.lane.b32.xlu0 %v2705_v21, %s2366_s27 }
 0x2d4   : > { %925 = vst [vmem:[%s2620_s20 + $0x18] sm:$0x4] %v924_v61  ;;  %972 = vst [vmem:[%s2620_s20 + $0x10] sm:$0x4] %v971_v44  ;;  %1734 = vrot.lane.b32.xlu1 %v2714_v54, %s2364_s22 }
 0x2d5   : > { %v947_v50 = vpop.permute.xlu0 %946 }
 0x2d6   : > { %v898_v39 = vpop.permute.xlu1 %897  ;;  %v976_v43 = vld [vmem:[%s2620_s20 + $0x20] sm:$0x4] }
 0x2d7   : > { %v930_v46 = vsel %vm2931_vm10, %v898_v39, %v929_v45  ;;  %v977_v41 = vsel %vm2968_vm9, %v947_v50, %v976_v43  ;;  %1776 = vrot.lane.b32.xlu0 %v2702_v20, %s2365_s23  ;;  %v1027_v20 = vld [vmem:[%s2620_s20 + $0x20] sm:$0x8]  ;;  %v783_v50 = vld [vmem:[%s2620_s20 + $0x38] sm:$0x1]  ;;  %v932_v43 = vld [vmem:[%s2620_s20 + $0x30] sm:$0x4] }
 0x2d8   : > { %931 = vst [vmem:[%s2620_s20 + $0x28] sm:$0x4] %v930_v46  ;;  %978 = vst [vmem:[%s2620_s20 + $0x20] sm:$0x4] %v977_v41  ;;  %1826 = vrot.lane.b32.xlu1 %v2711_v30, %s2366_s27  ;;  %v834_v46 = vld [vmem:[%s2620_s20 + $0x38] sm:$0x2] }
 0x2d9   : > { %v993_v56 = vpop.permute.xlu0 %992 }
 0x2da   : > { %v945_v52 = vpop.permute.xlu1 %944  ;;  %v1022_v57 = vsel %vm2962_vm7, %v993_v56, %v1021_v47 }
 0x2db   : > { %v973_v58 = vld [vmem:[%s2620_s20 + $0x18] sm:$0x4]  ;;  %1023 = vst [vmem:[%s2620_s20 + $0x10] sm:$0x8] %v1022_v57  ;;  %1780 = vrot.lane.b32.xlu0 %v2705_v21, %s2365_s23 }
 0x2dc   : > { %v974_v11 = vsel %vm2968_vm9, %v945_v52, %v973_v58  ;;  %1830 = vrot.lane.b32.xlu1 %v2714_v54, %s2366_s27 }
 0x2dd   : > { %975 = vst [vmem:[%s2620_s20 + $0x18] sm:$0x4] %v974_v11  ;;  %v997_v59 = vpop.permute.xlu0 %996 }
 0x2de   : > { %v949_v60 = vpop.permute.xlu1 %948  ;;  %v1028_v62 = vsel %vm2962_vm7, %v997_v59, %v1027_v20  ;;  %v1033_v59 = vld [vmem:[%s2620_s20 + $0x30] sm:$0x8] }
 0x2df   : > { %v979_v2 = vld [vmem:[%s2620_s20 + $0x28] sm:$0x4]  ;;  %1029 = vst [vmem:[%s2620_s20 + $0x20] sm:$0x8] %v1028_v62  ;;  %1970 = vrot.lane.b32.xlu0 %v2738_v49, %s2367_s29 }
 0x2e0   : > { %v980_v21 = vsel %vm2968_vm9, %v949_v60, %v979_v2  ;;  %1778 = vrot.lane.b32.xlu1 %v2711_v30, %s2365_s23  ;;  %v1030_v30 = vld [vmem:[%s2620_s20 + $0x28] sm:$0x8]  ;;  %v935_v60 = vld [vmem:[%s2620_s20 + $0x38] sm:$0x4] }
 0x2e1   : > { %981 = vst [vmem:[%s2620_s20 + $0x28] sm:$0x4] %v980_v21  ;;  %v1142_v4 = vpop.permute.xlu0 %1141 }
 0x2e2   : > { %v995_v5 = vpop.permute.xlu1 %994  ;;  %v1155_v9 = vrot.slane %v1142_v4, 4  ;;  %v1186_v26 = vld [vmem:[%s2620_s20 + $0x10] sm:$0x8] }
 0x2e3   : > { %v1025_v15 = vsel %vm2962_vm7, %v995_v5, %v1024_v3  ;;  %1974 = vrot.lane.b32.xlu0 %v2765_v10, %s2367_s29 }
 0x2e4   : > { %1026 = vst [vmem:[%s2620_s20 + $0x18] sm:$0x8] %v1025_v15  ;;  %v1164_v49 = vsel %vm1161_vm0, %v1142_v4, %v1155_v9  ;;  %1782 = vrot.lane.b32.xlu1 %v2714_v54, %s2365_s23 }
 0x2e5   : > { %v1187_v28 = vsel %vm2996_vm1, %v1164_v49, %v1186_v26  ;;  %v1146_v63 = vpop.permute.xlu0 %1145 }
 0x2e6   : > { %1188 = vst [vmem:[%s2620_s20 + $0x10] sm:$0x8] %v1187_v28  ;;  %v999_v32 = vpop.permute.xlu1 %998  ;;  %v1157_v37 = vrot.slane %v1146_v63, 4  ;;  %v1192_v1 = vld [vmem:[%s2620_s20 + $0x20] sm:$0x8] }
 0x2e7   : > { %v1031_v10 = vsel %vm2962_vm7, %v999_v32, %v1030_v30  ;;  %1592 = vrot.lane.b32.xlu0 %v2717_v31, %s2351_s9  ;;  %v1604_v28 = vld [vmem:[%s2620_s20 + $0x4] sm:$0x1] }
 0x2e8   : > { %1032 = vst [vmem:[%s2620_s20 + $0x28] sm:$0x8] %v1031_v10  ;;  %v1166_v54 = vsel %vm1161_vm0, %v1146_v63, %v1157_v37  ;;  %1972 = vrot.lane.b32.xlu1 %v1937_v12, %s2367_s29 }
 0x2e9   : > { %v1193_v7 = vsel %vm2996_vm1, %v1166_v54, %v1192_v1  ;;  %v749_v8 = vpop.permute.xlu0 %748 }
 0x2ea   : > { %1194 = vst [vmem:[%s2620_s20 + $0x20] sm:$0x8] %v1193_v7  ;;  %v1144_v19 = vpop.permute.xlu1 %1143  ;;  %v781_v13 = vsel %vm2910_vm4, %v749_v8, %v780_v42 }
 0x2eb   : > { %v1156_v17 = vrot.slane %v1144_v19, 4  ;;  %782 = vst [vmem:[%s2620_s20 + $0x30] sm:$0x1] %v781_v13  ;;  %1640 = vrot.lane.b32.xlu0 %v2717_v31, %s2350_s8  ;;  %v1189_v22 = vld [vmem:[%s2620_s20 + $0x18] sm:$0x8] }
 0x2ec   : > { %1976 = vrot.lane.b32.xlu1 %v1951_v29, %s2367_s29 }
 0x2ed   : > { %v1165_v12 = vsel %vm1161_vm0, %v1144_v19, %v1156_v17  ;;  %v799_v23 = vpop.permute.xlu0 %798 }
 0x2ee   : > { %v1190_v24 = vsel %vm2996_vm1, %v1165_v12, %v1189_v22  ;;  %v1148_v25 = vpop.permute.xlu1 %1147  ;;  %v832_v33 = vsel %vm2900_vm3, %v799_v23, %v831_v55  ;;  %v1607_v55 = vld [vmem:[%s2620_s20 + $0xc] sm:$0x1]  ;;  %v1748_v23 = vld [vmem:[%s2620_s20 + $0x4] sm:$0x4] }
 0x2ef   : > { %1191 = vst [vmem:[%s2620_s20 + $0x18] sm:$0x8] %v1190_v24  ;;  %v1158_v48 = vrot.slane %v1148_v25, 4  ;;  %833 = vst [vmem:[%s2620_s20 + $0x30] sm:$0x2] %v832_v33  ;;  %1736 = vrot.lane.b32.xlu0 %v2717_v31, %s2364_s22 }
 0x2f0   : > { %1594 = vrot.lane.b32.xlu1 %v2725_v40, %s2351_s9  ;;  %v1195_v29 = vld [vmem:[%s2620_s20 + $0x28] sm:$0x8]  ;;  %s2044_s9 = sshll.u32 %s2620_s20, 4  ;;  %s3518_s9 = int_to_ptr.vmem [resolvable:$true] %s2044_s9 }
 0x2f1   : > { %v1167_v14 = vsel %vm1161_vm0, %v1148_v25, %v1158_v48  ;;  %v850_v61 = vpop.permute.xlu0 %849  ;;  %v1655_v25 = vld [vmem:[%s2620_s20 + $0xc] sm:$0x2]  ;;  %s2265_s6 = scalar_lea.vmem %s3518_s9, 1024  ;;  %p2272_p0 = scmp.lt.s32.totalorder %s3518_s9, %s2270_s10 }
 0x2f2   : > { %v1196_v44 = vsel %vm2996_vm1, %v1167_v14, %v1195_v29  ;;  %v751_v45 = vpop.permute.xlu1 %750  ;;  %p2266_p11 = scmp.ne.s32.totalorder %s3518_s9, %s2265_s6  ;;  %p2273_p1 = scmp.lt.s32.totalorder %s2271_s11, %s2265_s6 }
 0x2f3   : > { %1197 = vst [vmem:[%s2620_s20 + $0x28] sm:$0x8] %v1196_v44  ;;  %v784_v39 = vsel %vm2910_vm4, %v751_v45, %v783_v50  ;;  %1832 = vrot.lane.b32.xlu0 %v2717_v31, %s2366_s27  ;;  %v1844_v45 = vld [vmem:[%s2620_s20 + $0x4] sm:$0x8] }
 0x2f4   : > { %785 = vst [vmem:[%s2620_s20 + $0x38] sm:$0x1] %v784_v39  ;;  %1642 = vrot.lane.b32.xlu1 %v2725_v40, %s2350_s8  ;;  %s2163_s8 = sshll.u32 %s2417_s19, 10  ;;  %s3529_s19 = scalar_lea.sflag [#allocation5], %s188_s13 }
 0x2f5   : > { %v900_v41 = vpop.permute.xlu0 %899  ;;  %s3516_s5 = scalar_lea.hbm %s3574_s4, %s2163_s8  ;;  %p2267_p12 = pnand %p2266_p11, %p2434_p5 }
 0x2f6   : > { %v881_v47 = vld [vmem:[%s2620_s20 + $0x30] sm:$0x2]  ;;  %v801_v56 = vpop.permute.xlu1 %800  ;;  %v933_v52 = vsel %vm2931_vm10, %v900_v41, %v932_v43  ;;  %p2274_p2 = por %p2273_p1, %p2272_p0 }
 0x2f7   : > { %v882_v57 = vsel %vm2938_vm11, %v850_v61, %v881_v47  ;;  %v835_v58 = vsel %vm2900_vm3, %v801_v56, %v834_v46  ;;  %934 = vst [vmem:[%s2620_s20 + $0x30] sm:$0x4] %v933_v52  ;;  %1688 = vrot.lane.b32.xlu0 %v2717_v31, %s2361_s28  ;;  %v1751_v46 = vld [vmem:[%s2620_s20 + $0xc] sm:$0x4]  ;;  %p2268_p13 = pneg %p2267_p12 }
 0x2f8   : > { %883 = vst [vmem:[%s2620_s20 + $0x30] sm:$0x2] %v882_v57  ;;  %836 = vst [vmem:[%s2620_s20 + $0x38] sm:$0x2] %v835_v58  ;;  %1738 = vrot.lane.b32.xlu1 %v2725_v40, %s2364_s22 }
 0x2f9   : > { %v951_v20 = vpop.permute.xlu0 %950  ;;  %p2275_p3 = pnand %p2274_p2, %p2268_p13 }
 0x2fa   : > { %v852_v11 = vpop.permute.xlu1 %851 }
 0x2fb   : > { %1978 = vrot.lane.b32.xlu0 %v2778_v16, %s2367_s29 }
 0x2fc   : > { %1834 = vrot.lane.b32.xlu1 %v2725_v40, %s2366_s27 }
 0x2fd   : > { %v1001_v62 = vpop.permute.xlu0 %1000 }
 0x2fe   : > { %v982_v2 = vld [vmem:[%s2620_s20 + $0x30] sm:$0x4]  ;;  %v902_v21 = vpop.permute.xlu1 %901  ;;  %v1034_v3 = vsel %vm2962_vm7, %v1001_v62, %v1033_v59 }
 0x2ff   : > { %v884_v4 = vld [vmem:[%s2620_s20 + $0x38] sm:$0x2]  ;;  %v983_v5 = vsel %vm2968_vm9, %v951_v20, %v982_v2  ;;  %v936_v16 = vsel %vm2931_vm10, %v902_v21, %v935_v60  ;;  %1035 = vst [vmem:[%s2620_s20 + $0x30] sm:$0x8] %v1034_v3  ;;  %1784 = vrot.lane.b32.xlu0 %v2717_v31, %s2365_s23  ;;  %v1036_v31 = vld [vmem:[%s2620_s20 + $0x38] sm:$0x8] }
 0x300   : > { %v885_v9 = vsel %vm2938_vm11, %v852_v11, %v884_v4  ;;  %984 = vst [vmem:[%s2620_s20 + $0x30] sm:$0x4] %v983_v5  ;;  %937 = vst [vmem:[%s2620_s20 + $0x38] sm:$0x4] %v936_v16  ;;  %1690 = vrot.lane.b32.xlu1 %v2725_v40, %s2361_s28  ;;  %v1847_v11 = vld [vmem:[%s2620_s20 + $0xc] sm:$0x8] }
 0x301   : > { %886 = vst [vmem:[%s2620_s20 + $0x38] sm:$0x2] %v885_v9  ;;  %v1150_v15 = vpop.permute.xlu0 %1149  ;;  %v1610_v16 = vld [vmem:[%s2620_s20 + $0x14] sm:$0x1] }
 0x302   : > { %v953_v49 = vpop.permute.xlu1 %952  ;;  %v1159_v26 = vrot.slane %v1150_v15, 4 }
 0x304   : > { %1980 = vrot.lane.b32.xlu1 %v1965_v38, %s2367_s29  ;;  %v1168_v63 = vsel %vm1161_vm0, %v1150_v15, %v1159_v26 }
 0x305   : > { %v1581_v30 = vpop.permute.xlu0 %1580 }
 0x306   : > { %v1198_v32 = vld [vmem:[%s2620_s20 + $0x30] sm:$0x8]  ;;  %v1003_v37 = vpop.permute.xlu1 %1002  ;;  %v1605_v10 = vsel %vm2910_vm4, %v1581_v30, %v1604_v28  ;;  %v1616_v30 = vld [vmem:[%s2620_s20 + $0x24] sm:$0x1] }
 0x307   : > { %v985_v54 = vld [vmem:[%s2620_s20 + $0x38] sm:$0x4]  ;;  %v1199_v1 = vsel %vm2996_vm1, %v1168_v63, %v1198_v32  ;;  %v1037_v34 = vsel %vm2962_vm7, %v1003_v37, %v1036_v31  ;;  %1606 = vst [vmem:[%s2620_s20 + $0x4] sm:$0x1] %v1605_v10  ;;  %v1658_v37 = vld [vmem:[%s2620_s20 + $0x14] sm:$0x2] }
 0x308   : > { %v986_v38 = vsel %vm2968_vm9, %v953_v49, %v985_v54  ;;  %1200 = vst [vmem:[%s2620_s20 + $0x30] sm:$0x8] %v1199_v1  ;;  %1038 = vst [vmem:[%s2620_s20 + $0x38] sm:$0x8] %v1037_v34  ;;  %1786 = vrot.lane.b32.xlu1 %v2725_v40, %s2365_s23 }
 0x309   : > { %987 = vst [vmem:[%s2620_s20 + $0x38] sm:$0x4] %v986_v38  ;;  %v1629_v7 = vpop.permute.xlu0 %1628  ;;  %v1613_v38 = vld [vmem:[%s2620_s20 + $0x1c] sm:$0x1] }
 0x30a   : > { %v1152_v8 = vpop.permute.xlu1 %1151  ;;  %v1653_v42 = vsel %vm2900_vm3, %v1629_v7, %v1652_v18 }
 0x30b   : > { %v1160_v19 = vrot.slane %v1152_v8, 4  ;;  %1654 = vst [vmem:[%s2620_s20 + $0x4] sm:$0x2] %v1653_v42  ;;  %v1664_v42 = vld [vmem:[%s2620_s20 + $0x24] sm:$0x2] }
 0x30d   : > { %v1677_v13 = vpop.permute.xlu0 %1676  ;;  %v1169_v12 = vsel %vm1161_vm0, %v1152_v8, %v1160_v19 }
 0x30e   : > { %v1583_v17 = vpop.permute.xlu1 %1582 }
 0x30f   : > { %v1201_v40 = vld [vmem:[%s2620_s20 + $0x38] sm:$0x8]  ;;  %v1608_v22 = vsel %vm2910_vm4, %v1583_v17, %v1607_v55  ;;  %v1619_v17 = vld [vmem:[%s2620_s20 + $0x2c] sm:$0x1] }
 0x310   : > { %v1202_v24 = vsel %vm2996_vm1, %v1169_v12, %v1201_v40  ;;  %1609 = vst [vmem:[%s2620_s20 + $0xc] sm:$0x1] %v1608_v22  ;;  %v1661_v40 = vld [vmem:[%s2620_s20 + $0x1c] sm:$0x2] }
 0x311   : > { %1203 = vst [vmem:[%s2620_s20 + $0x38] sm:$0x8] %v1202_v24  ;;  %v1725_v33 = vpop.permute.xlu0 %1724 }
 0x312   : > { %v1700_v48 = vld [vmem:[%s2620_s20 + $0x4] sm:$0x2]  ;;  %v1631_v14 = vpop.permute.xlu1 %1630  ;;  %v1749_v29 = vsel %vm2931_vm10, %v1725_v33, %v1748_v23 }
 0x313   : > { %v1701_v61 = vsel %vm2938_vm11, %v1677_v13, %v1700_v48  ;;  %v1656_v44 = vsel %vm2900_vm3, %v1631_v14, %v1655_v25  ;;  %1750 = vst [vmem:[%s2620_s20 + $0x4] sm:$0x4] %v1749_v29  ;;  %v1667_v48 = vld [vmem:[%s2620_s20 + $0x2c] sm:$0x2] }
 0x314   : > { %1702 = vst [vmem:[%s2620_s20 + $0x4] sm:$0x2] %v1701_v61  ;;  %1657 = vst [vmem:[%s2620_s20 + $0xc] sm:$0x2] %v1656_v44 }
 0x315   : > { %v1821_v50 = vpop.permute.xlu0 %1820 }
 0x316   : > { %v1679_v39 = vpop.permute.xlu1 %1678  ;;  %v1845_v43 = vsel %vm2962_vm7, %v1821_v50, %v1844_v45  ;;  %v1754_v50 = vld [vmem:[%s2620_s20 + $0x14] sm:$0x4] }
 0x317   : > { %1846 = vst [vmem:[%s2620_s20 + $0x4] sm:$0x8] %v1845_v43 }
 0x319   : > { %v1773_v41 = vpop.permute.xlu0 %1772 }
 0x31a   : > { %v1727_v47 = vpop.permute.xlu1 %1726  ;;  %v1796_v56 = vld [vmem:[%s2620_s20 + $0x4] sm:$0x4] }
 0x31b   : > { %v1703_v52 = vld [vmem:[%s2620_s20 + $0xc] sm:$0x2]  ;;  %v1752_v57 = vsel %vm2931_vm10, %v1727_v47, %v1751_v46  ;;  %v1797_v58 = vsel %vm2968_vm9, %v1773_v41, %v1796_v56  ;;  %v1760_v47 = vld [vmem:[%s2620_s20 + $0x24] sm:$0x4] }
 0x31c   : > { %v1704_v20 = vsel %vm2938_vm11, %v1679_v39, %v1703_v52  ;;  %1753 = vst [vmem:[%s2620_s20 + $0xc] sm:$0x4] %v1752_v57  ;;  %1798 = vst [vmem:[%s2620_s20 + $0x4] sm:$0x4] %v1797_v58 }
 0x31d   : > { %1705 = vst [vmem:[%s2620_s20 + $0xc] sm:$0x2] %v1704_v20  ;;  %v1967_v59 = vpop.permute.xlu0 %1966 }
 0x31e   : > { %v1823_v60 = vpop.permute.xlu1 %1822  ;;  %v1982_v62 = vrot.slane %v1967_v59, 4  ;;  %v2006_v3 = vld [vmem:[%s2620_s20 + $0x4] sm:$0x8] }
 0x31f   : > { %v1848_v2 = vsel %vm2962_vm7, %v1823_v60, %v1847_v11  ;;  %v1850_v11 = vld [vmem:[%s2620_s20 + $0x14] sm:$0x8]  ;;  %v1757_v60 = vld [vmem:[%s2620_s20 + $0x1c] sm:$0x4] }
 0x320   : > { %1849 = vst [vmem:[%s2620_s20 + $0xc] sm:$0x8] %v1848_v2  ;;  %v1990_v21 = vsel %vm1161_vm0, %v1967_v59, %v1982_v62 }
 0x321   : > { %v2007_v4 = vsel %vm2996_vm1, %v1990_v21, %v2006_v3  ;;  %v1585_v5 = vpop.permute.xlu0 %1584 }
 0x322   : > { %2008 = vst [vmem:[%s2620_s20 + $0x4] sm:$0x8] %v2007_v4  ;;  %v1775_v9 = vpop.permute.xlu1 %1774  ;;  %v1611_v15 = vsel %vm2910_vm4, %v1585_v5, %v1610_v16  ;;  %v1856_v4 = vld [vmem:[%s2620_s20 + $0x24] sm:$0x8]  ;;  %v1763_v5 = vld [vmem:[%s2620_s20 + $0x2c] sm:$0x4] }
 0x323   : > { %v1799_v49 = vld [vmem:[%s2620_s20 + $0xc] sm:$0x4]  ;;  %1612 = vst [vmem:[%s2620_s20 + $0x14] sm:$0x1] %v1611_v15 }
 0x324   : > { %v1800_v26 = vsel %vm2968_vm9, %v1775_v9, %v1799_v49 }
 0x325   : > { %1801 = vst [vmem:[%s2620_s20 + $0xc] sm:$0x4] %v1800_v26  ;;  %v1589_v31 = vpop.permute.xlu0 %1588  ;;  %v1853_v26 = vld [vmem:[%s2620_s20 + $0x1c] sm:$0x8] }
 0x326   : > { %v1969_v28 = vpop.permute.xlu1 %1968  ;;  %v1617_v63 = vsel %vm2910_vm4, %v1589_v31, %v1616_v30 }
 0x327   : > { %v1983_v32 = vrot.slane %v1969_v28, 4  ;;  %1618 = vst [vmem:[%s2620_s20 + $0x24] sm:$0x1] %v1617_v63  ;;  %v2009_v54 = vld [vmem:[%s2620_s20 + $0xc] sm:$0x8] }
 0x329   : > { %v1991_v10 = vsel %vm1161_vm0, %v1969_v28, %v1983_v32  ;;  %v1633_v1 = vpop.permute.xlu0 %1632 }
 0x32a   : > { %v2010_v34 = vsel %vm2996_vm1, %v1991_v10, %v2009_v54  ;;  %v1587_v18 = vpop.permute.xlu1 %1586  ;;  %v1659_v7 = vsel %vm2900_vm3, %v1633_v1, %v1658_v37  ;;  %v1859_v37 = vld [vmem:[%s2620_s20 + $0x2c] sm:$0x8] }
 0x32b   : > { %2011 = vst [vmem:[%s2620_s20 + $0xc] sm:$0x8] %v2010_v34  ;;  %v1614_v8 = vsel %vm2910_vm4, %v1587_v18, %v1613_v38  ;;  %1660 = vst [vmem:[%s2620_s20 + $0x14] sm:$0x2] %v1659_v7 }
 0x32c   : > { %1615 = vst [vmem:[%s2620_s20 + $0x1c] sm:$0x1] %v1614_v8 }
 0x32d   : > { %v1637_v19 = vpop.permute.xlu0 %1636 }
 0x32e   : > { %v1591_v13 = vpop.permute.xlu1 %1590  ;;  %v1665_v55 = vsel %vm2900_vm3, %v1637_v19, %v1664_v42 }
 0x32f   : > { %v1620_v12 = vsel %vm2910_vm4, %v1591_v13, %v1619_v17  ;;  %1666 = vst [vmem:[%s2620_s20 + $0x24] sm:$0x2] %v1665_v55 }
 0x330   : > { %1621 = vst [vmem:[%s2620_s20 + $0x2c] sm:$0x1] %v1620_v12 }
 0x331   : > { %v1681_v22 = vpop.permute.xlu0 %1680 }
 0x332   : > { %v1635_v23 = vpop.permute.xlu1 %1634  ;;  %v1706_v24 = vld [vmem:[%s2620_s20 + $0x14] sm:$0x2] }
 0x333   : > { %v1662_v25 = vsel %vm2900_vm3, %v1635_v23, %v1661_v40  ;;  %v1707_v33 = vsel %vm2938_vm11, %v1681_v22, %v1706_v24 }
 0x334   : > { %1663 = vst [vmem:[%s2620_s20 + $0x1c] sm:$0x2] %v1662_v25  ;;  %1708 = vst [vmem:[%s2620_s20 + $0x14] sm:$0x2] %v1707_v33 }
 0x335   : > { %v1685_v14 = vpop.permute.xlu0 %1684 }
 0x336   : > { %v1639_v29 = vpop.permute.xlu1 %1638  ;;  %v1712_v61 = vld [vmem:[%s2620_s20 + $0x24] sm:$0x2] }
 0x337   : > { %v1668_v44 = vsel %vm2900_vm3, %v1639_v29, %v1667_v48  ;;  %v1713_v45 = vsel %vm2938_vm11, %v1685_v14, %v1712_v61  ;;  %v1622_v29 = vld [vmem:[%s2620_s20 + $0x34] sm:$0x1] }
 0x338   : > { %1669 = vst [vmem:[%s2620_s20 + $0x2c] sm:$0x2] %v1668_v44  ;;  %1714 = vst [vmem:[%s2620_s20 + $0x24] sm:$0x2] %v1713_v45 }
 0x339   : > { %v1729_v39 = vpop.permute.xlu0 %1728 }
 0x33a   : > { %v1683_v43 = vpop.permute.xlu1 %1682  ;;  %v1755_v46 = vsel %vm2931_vm10, %v1729_v39, %v1754_v50  ;;  %v1670_v50 = vld [vmem:[%s2620_s20 + $0x34] sm:$0x2] }
 0x33b   : > { %v1709_v41 = vld [vmem:[%s2620_s20 + $0x1c] sm:$0x2]  ;;  %1756 = vst [vmem:[%s2620_s20 + $0x14] sm:$0x4] %v1755_v46 }
 0x33c   : > { %v1710_v56 = vsel %vm2938_vm11, %v1683_v43, %v1709_v41 }
 0x33d   : > { %1711 = vst [vmem:[%s2620_s20 + $0x1c] sm:$0x2] %v1710_v56  ;;  %v1733_v52 = vpop.permute.xlu0 %1732 }
 0x33e   : > { %v1687_v57 = vpop.permute.xlu1 %1686  ;;  %v1761_v58 = vsel %vm2931_vm10, %v1733_v52, %v1760_v47 }
 0x33f   : > { %v1715_v20 = vld [vmem:[%s2620_s20 + $0x2c] sm:$0x2]  ;;  %1762 = vst [vmem:[%s2620_s20 + $0x24] sm:$0x4] %v1761_v58 }
 0x340   : > { %v1716_v59 = vsel %vm2938_vm11, %v1687_v57, %v1715_v20  ;;  %v1766_v57 = vld [vmem:[%s2620_s20 + $0x34] sm:$0x4] }
 0x341   : > { %1717 = vst [vmem:[%s2620_s20 + $0x2c] sm:$0x2] %v1716_v59  ;;  %v1825_v62 = vpop.permute.xlu0 %1824 }
 0x342   : > { %v1731_v2 = vpop.permute.xlu1 %1730  ;;  %v1851_v21 = vsel %vm2962_vm7, %v1825_v62, %v1850_v11  ;;  %v1802_v30 = vld [vmem:[%s2620_s20 + $0x14] sm:$0x4]  ;;  %v1625_v62 = vld [vmem:[%s2620_s20 + $0x3c] sm:$0x1] }
 0x343   : > { %v1758_v3 = vsel %vm2931_vm10, %v1731_v2, %v1757_v60  ;;  %1852 = vst [vmem:[%s2620_s20 + $0x14] sm:$0x8] %v1851_v21 }
 0x344   : > { %1759 = vst [vmem:[%s2620_s20 + $0x1c] sm:$0x4] %v1758_v3  ;;  %v1862_v3 = vld [vmem:[%s2620_s20 + $0x34] sm:$0x8] }
 0x345   : > { %v1829_v16 = vpop.permute.xlu0 %1828 }
 0x346   : > { %v1735_v9 = vpop.permute.xlu1 %1734  ;;  %v1857_v15 = vsel %vm2962_vm7, %v1829_v16, %v1856_v4  ;;  %v1808_v54 = vld [vmem:[%s2620_s20 + $0x24] sm:$0x4]  ;;  %v1673_v4 = vld [vmem:[%s2620_s20 + $0x3c] sm:$0x2] }
 0x347   : > { %v1764_v49 = vsel %vm2931_vm10, %v1735_v9, %v1763_v5  ;;  %1858 = vst [vmem:[%s2620_s20 + $0x24] sm:$0x8] %v1857_v15 }
 0x348   : > { %1765 = vst [vmem:[%s2620_s20 + $0x2c] sm:$0x4] %v1764_v49 }
 0x349   : > { %v1777_v31 = vpop.permute.xlu0 %1776 }
 0x34a   : > { %v1827_v28 = vpop.permute.xlu1 %1826  ;;  %v1803_v63 = vsel %vm2968_vm9, %v1777_v31, %v1802_v30  ;;  %v2012_v17 = vld [vmem:[%s2620_s20 + $0x14] sm:$0x8] }
 0x34b   : > { %v1854_v32 = vsel %vm2962_vm7, %v1827_v28, %v1853_v26  ;;  %1804 = vst [vmem:[%s2620_s20 + $0x14] sm:$0x4] %v1803_v63  ;;  %v1805_v8 = vld [vmem:[%s2620_s20 + $0x1c] sm:$0x4] }
 0x34c   : > { %1855 = vst [vmem:[%s2620_s20 + $0x1c] sm:$0x8] %v1854_v32 }
 0x34d   : > { %v1781_v10 = vpop.permute.xlu0 %1780 }
 0x34e   : > { %v1831_v1 = vpop.permute.xlu1 %1830  ;;  %v1809_v34 = vsel %vm2968_vm9, %v1781_v10, %v1808_v54  ;;  %v2018_v33 = vld [vmem:[%s2620_s20 + $0x24] sm:$0x8] }
 0x34f   : > { %v1860_v18 = vsel %vm2962_vm7, %v1831_v1, %v1859_v37  ;;  %1810 = vst [vmem:[%s2620_s20 + $0x24] sm:$0x4] %v1809_v34  ;;  %v1811_v22 = vld [vmem:[%s2620_s20 + $0x2c] sm:$0x4] }
 0x350   : > { %1861 = vst [vmem:[%s2620_s20 + $0x2c] sm:$0x8] %v1860_v18 }
 0x351   : > { %v1971_v38 = vpop.permute.xlu0 %1970 }
 0x352   : > { %v1779_v7 = vpop.permute.xlu1 %1778  ;;  %v1984_v42 = vrot.slane %v1971_v38, 4 }
 0x353   : > { %v1806_v19 = vsel %vm2968_vm9, %v1779_v7, %v1805_v8  ;;  %v2015_v43 = vld [vmem:[%s2620_s20 + $0x1c] sm:$0x8] }
 0x354   : > { %1807 = vst [vmem:[%s2620_s20 + $0x1c] sm:$0x4] %v1806_v19  ;;  %v1992_v13 = vsel %vm1161_vm0, %v1971_v38, %v1984_v42 }
 0x355   : > { %v2013_v55 = vsel %vm2996_vm1, %v1992_v13, %v2012_v17  ;;  %v1975_v12 = vpop.permute.xlu0 %1974 }
 0x356   : > { %2014 = vst [vmem:[%s2620_s20 + $0x14] sm:$0x8] %v2013_v55  ;;  %v1783_v40 = vpop.permute.xlu1 %1782  ;;  %v1986_v23 = vrot.slane %v1975_v12, 4 }
 0x357   : > { %v1812_v24 = vsel %vm2968_vm9, %v1783_v40, %v1811_v22  ;;  %v2021_v20 = vld [vmem:[%s2620_s20 + $0x2c] sm:$0x8] }
 0x358   : > { %1813 = vst [vmem:[%s2620_s20 + $0x2c] sm:$0x4] %v1812_v24  ;;  %v1994_v25 = vsel %vm1161_vm0, %v1975_v12, %v1986_v23 }
 0x359   : > { %v2019_v48 = vsel %vm2996_vm1, %v1994_v25, %v2018_v33  ;;  %v1593_v14 = vpop.permute.xlu0 %1592 }
 0x35a   : > { %2020 = vst [vmem:[%s2620_s20 + $0x24] sm:$0x8] %v2019_v48  ;;  %v1973_v61 = vpop.permute.xlu1 %1972  ;;  %v1623_v44 = vsel %vm2910_vm4, %v1593_v14, %v1622_v29 }
 0x35b   : > { %v1985_v45 = vrot.slane %v1973_v61, 4  ;;  %1624 = vst [vmem:[%s2620_s20 + $0x34] sm:$0x1] %v1623_v44 }
 0x35d   : > { %v1993_v39 = vsel %vm1161_vm0, %v1973_v61, %v1985_v45  ;;  %v1641_v46 = vpop.permute.xlu0 %1640 }
 0x35e   : > { %v2016_v41 = vsel %vm2996_vm1, %v1993_v39, %v2015_v43  ;;  %v1977_v47 = vpop.permute.xlu1 %1976  ;;  %v1671_v56 = vsel %vm2900_vm3, %v1641_v46, %v1670_v50 }
 0x35f   : > { %2017 = vst [vmem:[%s2620_s20 + $0x1c] sm:$0x8] %v2016_v41  ;;  %v1987_v52 = vrot.slane %v1977_v47, 4  ;;  %1672 = vst [vmem:[%s2620_s20 + $0x34] sm:$0x2] %v1671_v56 }
 0x361   : > { %v1995_v58 = vsel %vm1161_vm0, %v1977_v47, %v1987_v52  ;;  %v1737_v11 = vpop.permute.xlu0 %1736 }
 0x362   : > { %v2022_v59 = vsel %vm2996_vm1, %v1995_v58, %v2021_v20  ;;  %v1595_v60 = vpop.permute.xlu1 %1594  ;;  %v1767_v2 = vsel %vm2931_vm10, %v1737_v11, %v1766_v57 }
 0x363   : > { %2023 = vst [vmem:[%s2620_s20 + $0x2c] sm:$0x8] %v2022_v59  ;;  %v1626_v21 = vsel %vm2910_vm4, %v1595_v60, %v1625_v62  ;;  %1768 = vst [vmem:[%s2620_s20 + $0x34] sm:$0x4] %v1767_v2 }
 0x364   : > { %1627 = vst [vmem:[%s2620_s20 + $0x3c] sm:$0x1] %v1626_v21 }
 0x365   : > { %v1833_v5 = vpop.permute.xlu0 %1832 }
 0x366   : > { %v1643_v16 = vpop.permute.xlu1 %1642  ;;  %v1863_v9 = vsel %vm2962_vm7, %v1833_v5, %v1862_v3  ;;  %v1718_v26 = vld [vmem:[%s2620_s20 + $0x34] sm:$0x2] }
 0x367   : > { %v1674_v15 = vsel %vm2900_vm3, %v1643_v16, %v1673_v4  ;;  %1864 = vst [vmem:[%s2620_s20 + $0x34] sm:$0x8] %v1863_v9 }
 0x368   : > { %1675 = vst [vmem:[%s2620_s20 + $0x3c] sm:$0x2] %v1674_v15 }
 0x369   : > { %v1689_v49 = vpop.permute.xlu0 %1688 }
 0x36a   : > { %v1739_v31 = vpop.permute.xlu1 %1738  ;;  %v1719_v30 = vsel %vm2938_vm11, %v1689_v49, %v1718_v26  ;;  %v1814_v18 = vld [vmem:[%s2620_s20 + $0x34] sm:$0x4] }
 0x36b   : > { %v1770_v28 = vsel %vm2931_vm10, %v1739_v31, %v1769_v6  ;;  %1720 = vst [vmem:[%s2620_s20 + $0x34] sm:$0x2] %v1719_v30 }
 0x36c   : > { %1771 = vst [vmem:[%s2620_s20 + $0x3c] sm:$0x4] %v1770_v28 }
 0x36d   : > { %v1979_v63 = vpop.permute.xlu0 %1978 }
 0x36e   : > { %v1835_v32 = vpop.permute.xlu1 %1834  ;;  %v1988_v37 = vrot.slane %v1979_v63, 4  ;;  %v2024_v1 = vld [vmem:[%s2620_s20 + $0x34] sm:$0x8] }
 0x36f   : > { %v1866_v10 = vsel %vm2962_vm7, %v1835_v32, %v1865_v0  ;;  %v1721_v7 = vld [vmem:[%s2620_s20 + $0x3c] sm:$0x2] }
 0x370   : > { %1867 = vst [vmem:[%s2620_s20 + $0x3c] sm:$0x8] %v1866_v10  ;;  %v1996_v54 = vsel %vm1161_vm0, %v1979_v63, %v1988_v37 }
 0x371   : > { %v2025_v27 = vsel %vm2996_vm1, %v1996_v54, %v2024_v1  ;;  %v1785_v34 = vpop.permute.xlu0 %1784 }
 0x372   : > { %2026 = vst [vmem:[%s2620_s20 + $0x34] sm:$0x8] %v2025_v27  ;;  %v1691_v38 = vpop.permute.xlu1 %1690  ;;  %v1815_v51 = vsel %vm2968_vm9, %v1785_v34, %v1814_v18 }
 0x373   : > { %v1722_v8 = vsel %vm2938_vm11, %v1691_v38, %v1721_v7  ;;  %1816 = vst [vmem:[%s2620_s20 + $0x34] sm:$0x4] %v1815_v51  ;;  %v1817_v12 = vld [vmem:[%s2620_s20 + $0x3c] sm:$0x4] }
 0x374   : > { %1723 = vst [vmem:[%s2620_s20 + $0x3c] sm:$0x2] %v1722_v8 }
 0x376   : > { %v1981_v42 = vpop.permute.xlu1 %1980 }
 0x377   : > { %v1989_v19 = vrot.slane %v1981_v42, 4  ;;  %v2027_v17 = vld [vmem:[%s2620_s20 + $0x3c] sm:$0x8] }
 0x379   : > { %v1997_v13 = vsel %vm1161_vm0, %v1981_v42, %v1989_v19 }
 0x37a   : > { %v2028_v35 = vsel %vm2996_vm1, %v1997_v13, %v2027_v17  ;;  %v1787_v55 = vpop.permute.xlu1 %1786 }
 0x37b   : > { %2029 = vst [vmem:[%s2620_s20 + $0x3c] sm:$0x8] %v2028_v35  ;;  %v1818_v40 = vsel %vm2968_vm9, %v1787_v55, %v1817_v12 }
 0x37c   : > { %1819 = vst [vmem:[%s2620_s20 + $0x3c] sm:$0x4] %v1818_v40 }
 0x37d   : > { %2278 = shalt.err (!%p2275_p3)
}
 0x37e   : > { %s2279_s12 = scalar_lea.hbm %s3516_s5, 1024  ;;  %s2283_s20 = scalar_lea.hbm %s3574_s4, 2048 }
 0x37f   : > { %p2280_p4 = scmp.ne.s32.totalorder %s3516_s5, %s2279_s12  ;;  %p2284_p9 = scmp.lt.u32.totalorder %s3516_s5, %s3574_s4 }
 0x380   : > { %p2285_p10 = scmp.lt.u32.totalorder %s2283_s20, %s2279_s12  ;;  %p2287_p12 = scmp.lt.u32.totalorder %s2279_s12, %s3516_s5 }
 0x381   : > { %p2281_p7 = pnand %p2280_p4, %p2434_p5 }
 0x382   : > { %p2286_p11 = por %p2285_p10, %p2284_p9 }
 0x383   : > { %p2282_p8 = pneg %p2281_p7 }
 0x384   : > { %p2288_p13 = por %p2287_p12, %p2286_p11 }
 0x386   : > { %p2289_p0 = pnand %p2288_p13, %p2282_p8 }
 0x388   : > { %2292 = shalt.err (!%p2289_p0)
}
 0x389   : > { %s2369_s27 = smov 64   ;;  %s2370_s29 = smov 4  }
 0x38a   : > { %2164 = dma.vmem_to_hbm [thread:$0]  (%p2434_p5), %s3518_s9, 1024, %s3516_s5, %s3529_s19, %s2369_s27, %s2369_s27, %s2370_s29  }
 0x38b PF: > { %p2170_p1 = scmp.ge.s32.totalorder %s2327_s18, 2  ;;  %s2059_s8 = sand.u32 1, %s2315_s15  }
 0x38c   : > { %s2060_s28 = scalar_lea.sflag [#allocation5], %s2059_s8 }
 0x38d   : > { %p2167_p2 = pnand %p2170_p1, %p2438_p6 }
 0x38f   : > { %2310 = dma.done.wait (!%p2167_p2), %s2060_s28, 1024  }
 0x390   : > { %2312 = vsyncadd (!%p2167_p2), %s2060_s28, 4294966272  ;;  %p14_p3 = scmp.ge.s32.totalorder %s2421_s21, 4   ;;  %s3597_s15 = smov %s2319_s16 }
 0x391   : > { %s3598_s16 = smov %s2323_s17  ;;  %s3599_s17 = smov %s2432_s24 }
 0x392   : > { %s3600_s18 = smov %s2421_s21  ;;  %16 = sbr.rel (!%p14_p3) target bundleno = 3 (0x3), region = 71 }
 0x399   :  { %2065 = vsyncpa [#allocation5], 1 }
 0x39a   :  { %2067 = vsyncpa [#allocation5 + $0x1], 1 }

</bundles_post_ra>
